<compile_context>
chip_gen: v7x
topology: tpu7x:2x2x1
jax: 0.10.0
libtpu: 0.0.40
codegen_flags: <defaults>
</compile_context>

<pallas_src>
import functools

import jax
import jax.numpy as jnp
from jax.experimental import pallas as pl
from jax.experimental.pallas import tpu as pltpu

LANE = 128
_RESIDENT_XW_LIMIT_BYTES = 16 * 1024 * 1024   # keep resident XW well inside v7x's 64 MiB VMEM
_VMEM_LIMIT_CAP_BYTES = 56 * 1024 * 1024      # never request more than v7x can physically hold


def _round_up(x, m):
    return (x + m - 1) // m * m


def _pad2d(w, rows, cols):
    return jnp.zeros((rows, cols), w.dtype).at[: w.shape[0], : w.shape[1]].set(w)


def _pad1d(b, n):
    return jnp.zeros((n,), b.dtype).at[: b.shape[0]].set(b)


def _pad_nodes(n):
    """Pad node count so large (256/512) tiles divide evenly; <=25% waste."""
    if n <= 128:
        return 128
    if n <= 2048:
        return _round_up(n, 256)
    return _round_up(n, 512)


def _choose_tiles(n_pad):
    """tile_k: biggest of {512,256,128} dividing n_pad (fills the 256-wide MXU on
    v6e/v7x).  tile_m: same, but capped so there are >=2 row tiles (v7x megacore)."""
    tile_k = 128
    for t in (512, 256, 128):
        if n_pad % t == 0:
            tile_k = t
            break
    tile_m = tile_k
    for t in (512, 256, 128):
        if n_pad % t == 0 and n_pad // t >= 2:
            tile_m = t
            break
    return tile_m, tile_k


# ----------------------------------------------------------------------------
# Pallas kernels
# ----------------------------------------------------------------------------
def _xw_kernel(x_ref, w_ref, o_ref):
    # X @ W on the MXU (bf16 in, f32 accumulate), done once per layer.
    o_ref[...] = jnp.dot(
        x_ref[...], w_ref[...], preferred_element_type=jnp.float32
    ).astype(o_ref.dtype)


def _gcn_agg_kernel(a_ref, xw_ref, b_ref, o_ref, acc_ref, *,
                    apply_relu, xw_resident, tile_k):
    # grid = (row tiles i [parallel], reduction tiles k [arbitrary])
    k = pl.program_id(1)

    @pl.when(k == 0)
    def _init():
        acc_ref[...] = jnp.zeros_like(acc_ref)

    if xw_resident:
        # XW is the full array, loaded into VMEM once (constant index_map);
        # slice the k-tile locally instead of re-streaming it from HBM per row tile.
        start = pl.multiple_of(k * tile_k, tile_k)
        xw_tile = xw_ref[pl.ds(start, tile_k), :]
    else:
        xw_tile = xw_ref[...]

    acc_ref[...] += jnp.dot(a_ref[...], xw_tile, preferred_element_type=jnp.float32)

    @pl.when(k == pl.num_programs(1) - 1)
    def _finalize():
        h = acc_ref[...] + b_ref[...]          # f32 epilogue (v5e-friendly)
        if apply_relu:
            h = jnp.maximum(h, 0.0)
        o_ref[...] = h.astype(o_ref.dtype)


def _pool_fc_kernel(p_ref, h_ref, inv_ref, wfc_ref, bfc_ref, o_ref, acc_ref):
    # grid = (node tiles k [arbitrary]); pooled sums accumulate in f32 scratch,
    # mean + FC head applied (all in f32) on the last grid step.
    k = pl.program_id(0)

    @pl.when(k == 0)
    def _init():
        acc_ref[...] = jnp.zeros_like(acc_ref)

    acc_ref[...] += jnp.dot(
        p_ref[...], h_ref[...], preferred_element_type=jnp.float32
    )

    @pl.when(k == pl.num_programs(0) - 1)
    def _finalize():
        pooled = acc_ref[...] * inv_ref[...]                 # exact f32 mean
        logits = (
            jnp.dot(pooled, wfc_ref[...], preferred_element_type=jnp.float32)
            + bfc_ref[...]
        )
        o_ref[...] = logits.astype(o_ref.dtype)


# ----------------------------------------------------------------------------
# pallas_call wrappers
# ----------------------------------------------------------------------------
def feature_transform(x, w, *, tile_m):
    n_pad, f_in = x.shape
    f_out = w.shape[1]
    return pl.pallas_call(
        _xw_kernel,
        out_shape=jax.ShapeDtypeStruct((n_pad, f_out), jnp.bfloat16),
        grid_spec=pltpu.PrefetchScalarGridSpec(
            num_scalar_prefetch=0,
            grid=(n_pad // tile_m,),
            in_specs=[
                pl.BlockSpec((tile_m, f_in), lambda i: (i, 0)),
                pl.BlockSpec((f_in, f_out), lambda i: (0, 0)),
            ],
            out_specs=pl.BlockSpec((tile_m, f_out), lambda i: (i, 0)),
        ),
        compiler_params=pltpu.CompilerParams(dimension_semantics=("parallel",)),
    )(x, w)


def gcn_layer(a_norm, x, w, b, *, apply_relu, tile_m, tile_k):
    n_pad = a_norm.shape[0]
    f_out = w.shape[1]
    # Hoisted: XW computed once (not per A-tile).
    # TODO(synk): fuse this into the aggregation call once a core-safe "compute XW
    #             into resident scratch on first visit" pattern is wired up.
    xw = feature_transform(x, w, tile_m=tile_m)

    xw_bytes = n_pad * f_out * 2  # bf16
    xw_resident = xw_bytes <= _RESIDENT_XW_LIMIT_BYTES

    if xw_resident:
        xw_spec = pl.BlockSpec((n_pad, f_out), lambda i, k: (0, 0))   # loaded once
        xw_buf = 2 * xw_bytes
    else:
        xw_spec = pl.BlockSpec((tile_k, f_out), lambda i, k: (k, 0))  # streamed per k
        xw_buf = 2 * tile_k * f_out * 2

    # Explicit VMEM budget (double-buffered A + XW + f32 acc + output), capped for v7x.
    vmem_need = int(
        1.4 * (2 * tile_m * tile_k * 2 + xw_buf
               + tile_m * f_out * 4 + 2 * tile_m * f_out * 2 + 4 * f_out * 4)
    )
    vmem_limit = min(max(32 * 1024 * 1024, vmem_need), _VMEM_LIMIT_CAP_BYTES)

    return pl.pallas_call(
        functools.partial(
            _gcn_agg_kernel,
            apply_relu=apply_relu,
            xw_resident=xw_resident,
            tile_k=tile_k,
        ),
        out_shape=jax.ShapeDtypeStruct((n_pad, f_out), jnp.bfloat16),
        grid_spec=pltpu.PrefetchScalarGridSpec(
            num_scalar_prefetch=0,
            grid=(n_pad // tile_m, n_pad // tile_k),
            in_specs=[
                pl.BlockSpec((tile_m, tile_k), lambda i, k: (i, k)),  # A tile
                xw_spec,                                              # XW (resident/tiled)
                pl.BlockSpec((1, f_out), lambda i, k: (0, 0)),        # bias
            ],
            out_specs=pl.BlockSpec((tile_m, f_out), lambda i, k: (i, 0)),
            scratch_shapes=[pltpu.VMEM((tile_m, f_out), jnp.float32)],
        ),
        compiler_params=pltpu.CompilerParams(
            dimension_semantics=("parallel", "arbitrary"),
            vmem_limit_bytes=vmem_limit,
        ),
    )(a_norm, xw, b.reshape(1, -1))


def pool_and_fc(pool_oh, inv_counts, h, w_fc, b_fc, *, tile_k):
    g_pad = pool_oh.shape[0]
    n_pad, n2 = h.shape
    c_pad = w_fc.shape[1]
    return pl.pallas_call(
        _pool_fc_kernel,
        out_shape=jax.ShapeDtypeStruct((g_pad, c_pad), jnp.float32),
        grid_spec=pltpu.PrefetchScalarGridSpec(
            num_scalar_prefetch=0,
            grid=(n_pad // tile_k,),
            in_specs=[
                pl.BlockSpec((g_pad, tile_k), lambda k: (0, k)),  # P one-hot tile
                pl.BlockSpec((tile_k, n2), lambda k: (k, 0)),     # H2 tile
                pl.BlockSpec((g_pad, 1), lambda k: (0, 0)),       # 1/|graph|
                pl.BlockSpec((n2, c_pad), lambda k: (0, 0)),      # W_fc (f32, tiny)
                pl.BlockSpec((1, c_pad), lambda k: (0, 0)),       # b_fc
            ],
            out_specs=pl.BlockSpec((g_pad, c_pad), lambda k: (0, 0)),
            scratch_shapes=[pltpu.VMEM((g_pad, n2), jnp.float32)],
        ),
        compiler_params=pltpu.CompilerParams(dimension_semantics=("arbitrary",)),
    )(pool_oh, h, inv_counts, w_fc, b_fc.reshape(1, -1))


# ----------------------------------------------------------------------------
# Plain-JAX glue: normalized adjacency / pooling matrices from edge_index, batch
# ----------------------------------------------------------------------------
def build_norm_adj(edge_index, num_nodes, n_pad):
    """D^-1/2 (A + I) D^-1/2 at padded size; duplicate edges scatter-ADD (PyG parity)."""
    # TODO(synk): for large N build this block-sparse (PrefetchScalarGridSpec) instead
    #             of a dense f32 N_pad^2 pass.
    src, dst = edge_index[0], edge_index[1]
    a = jnp.zeros((n_pad, n_pad), jnp.float32)
    a = a.at[dst, src].add(1.0)
    idx = jnp.arange(num_nodes)
    a = a.at[idx, idx].add(1.0)  # add self-loops (GCNConv add_self_loops=True)
    deg = a.sum(axis=1)
    d_inv_sqrt = jnp.where(deg > 0, 1.0 / jnp.sqrt(deg), 0.0)
    # Fuse row/col scaling with the bf16 cast (single XLA fusion / HBM pass).
    return (a * (d_inv_sqrt[:, None] * d_inv_sqrt[None, :])).astype(jnp.bfloat16)


def build_pool(batch, num_graphs, n_pad, g_pad):
    """0/1 membership matrix (exact in bf16) + f32 reciprocal counts."""
    batch_pad = jnp.full((n_pad,), -1, jnp.int32).at[: batch.shape[0]].set(batch)
    oh = (batch_pad[None, :] == jnp.arange(g_pad)[:, None]).astype(jnp.float32)
    counts = oh.sum(axis=1, keepdims=True)
    inv = jnp.where(counts > 0, 1.0 / counts, 0.0)
    return oh.astype(jnp.bfloat16), inv.astype(jnp.float32)


# ----------------------------------------------------------------------------
# Full forward pass
# ----------------------------------------------------------------------------
@functools.partial(jax.jit, static_argnames=("num_graphs", "num_classes"))
def net_forward(params, x, edge_index, batch, num_graphs, num_classes):
    n, f_in = x.shape
    n_pad = _pad_nodes(n)
    tile_m, tile_k = _choose_tiles(n_pad)
    g_pad = _round_up(max(num_graphs, 16), 16)   # 16: native bf16 sublane packing

    f_in_p = _round_up(f_in, LANE)
    n1_p = _round_up(params["w1"].shape[1], LANE)
    n2_p = _round_up(params["w2"].shape[1], LANE)
    c_p = _round_up(num_classes, LANE)

    # Zero-pad once: lane-dense operands, bf16 matmul inputs, f32 biases / FC weight.
    w1 = _pad2d(params["w1"], f_in_p, n1_p).astype(jnp.bfloat16)
    w2 = _pad2d(params["w2"], n1_p, n2_p).astype(jnp.bfloat16)
    wfc = _pad2d(params["w_fc"], n2_p, c_p).astype(jnp.float32)   # tiny FC kept f32
    b1 = _pad1d(params["b1"], n1_p).astype(jnp.float32)
    b2 = _pad1d(params["b2"], n2_p).astype(jnp.float32)
    bfc = _pad1d(params["b_fc"], c_p).astype(jnp.float32)

    a_norm = build_norm_adj(edge_index, n, n_pad)
    pool_oh, inv_counts = build_pool(batch, num_graphs, n_pad, g_pad)
    x_pad = _pad2d(x.astype(jnp.float32), n_pad, f_in_p).astype(jnp.bfloat16)

    h1 = gcn_layer(a_norm, x_pad, w1, b1, apply_relu=True,
                   tile_m=tile_m, tile_k=tile_k)                    # conv1 + ReLU
    h2 = gcn_layer(a_norm, h1, w2, b2, apply_relu=False,
                   tile_m=tile_m, tile_k=tile_k)                    # conv2
    # TODO(synk): Dropout(p=0.25) is identity in eval mode; training-mode masking omitted.
    logits_pad = pool_and_fc(pool_oh, inv_counts, h2, wfc, bfc, tile_k=tile_k)
    return logits_pad[:num_graphs, :num_classes]


def init_params(key, in_features, n_1, n_2, num_classes):
    k1, k2, k3, k4, k5, k6 = jax.random.split(key, 6)
    scale = 0.1
    return {
        "w1": scale * jax.random.normal(k1, (in_features, n_1), jnp.float32),
        "b1": scale * jax.random.normal(k4, (n_1,), jnp.float32),
        "w2": scale * jax.random.normal(k2, (n_1, n_2), jnp.float32),
        "b2": scale * jax.random.normal(k5, (n_2,), jnp.float32),
        "w_fc": scale * jax.random.normal(k3, (n_2, num_classes), jnp.float32),
        "b_fc": scale * jax.random.normal(k6, (num_classes,), jnp.float32),
    }


def reference_forward(params, x, edge_index, batch, num_graphs):
    """Pure-JAX f32 reference (PyG semantics) for a correctness check."""
    n = x.shape[0]
    src, dst = edge_index[0], edge_index[1]
    a = jnp.zeros((n, n), jnp.float32).at[dst, src].add(1.0)
    a = a.at[jnp.arange(n), jnp.arange(n)].add(1.0)
    deg = a.sum(axis=1)
    dis = jnp.where(deg > 0, 1.0 / jnp.sqrt(deg), 0.0)
    a = dis[:, None] * a * dis[None, :]
    h = jnp.maximum(a @ (x @ params["w1"]) + params["b1"], 0.0)
    h = a @ (h @ params["w2"]) + params["b2"]
    oh = (batch[None, :] == jnp.arange(num_graphs)[:, None]).astype(jnp.float32)
    pooled = (oh @ h) / jnp.maximum(oh.sum(axis=1, keepdims=True), 1.0)
    return pooled @ params["w_fc"] + params["b_fc"]


if __name__ == "__main__":
    key = jax.random.PRNGKey(0)
    k_x, k_p = jax.random.split(key)

    # 2 ring graphs of 100 nodes each -> N=200 pads to 256 -> tile_m=128 (2 row tiles
    # for megacore), tile_k=256 (full-depth MXU contraction on v6e/v7x), resident XW.
    nodes_per_graph = 100
    num_graphs = 2
    num_nodes = nodes_per_graph * num_graphs
    in_features, n_1, n_2, num_classes = 4, 16, 32, 3

    def ring_edges(offset, n):
        s = jnp.arange(n, dtype=jnp.int32) + offset
        d = (jnp.arange(n, dtype=jnp.int32) + 1) % n + offset
        return jnp.stack([jnp.concatenate([s, d]), jnp.concatenate([d, s])])

    edge_index = jnp.concatenate(
        [ring_edges(0, nodes_per_graph), ring_edges(nodes_per_graph, nodes_per_graph)],
        axis=1,
    ).astype(jnp.int32)
    batch = jnp.concatenate(
        [
            jnp.zeros((nodes_per_graph,), jnp.int32),
            jnp.ones((nodes_per_graph,), jnp.int32),
        ]
    )
    x = jax.random.normal(k_x, (num_nodes, in_features), jnp.float32)
    params = init_params(k_p, in_features, n_1, n_2, num_classes)

    logits = net_forward(params, x, edge_index, batch, num_graphs, num_classes)
    jax.block_until_ready(logits)

    assert logits.shape == (num_graphs, num_classes)
    assert logits.dtype == jnp.float32

    ref = reference_forward(params, x, edge_index, batch, num_graphs)
    max_err = float(jnp.max(jnp.abs(logits - ref)))
    assert max_err < 2e-2, f"mismatch vs f32 reference: {max_err}"

    print("KERNEL_OK")
</pallas_src>

<mosaic_0001>
module attributes {stable_mosaic.version = 11 : i64} {
  func.func private @main(%arg0: i32) attributes {dimension_semantics = [#tpu.dimension_semantics<core_parallel>], iteration_bounds = array<i64: 2>, tpu.core_type = #tpu.core_type<sc_scalar_subcore>, window_params = []} {
    return
  }
}

module attributes {stable_mosaic.version = 11 : i64} {
  func.func private @main(%arg0: i32) attributes {dimension_semantics = [#tpu.dimension_semantics<core_parallel>], iteration_bounds = array<i64: 2>, tpu.core_type = #tpu.core_type<sc_scalar_subcore>, window_params = []} {
    return
  }
}

module attributes {stable_mosaic.version = 11 : i64} {
  func.func @_xw_kernel(%arg0: i32, %arg1: memref<128x128xbf16, #tpu.memory_space<vmem>>, %arg2: memref<128x128xbf16, #tpu.memory_space<vmem>>, %arg3: memref<128x128xbf16, #tpu.memory_space<vmem>>) attributes {dimension_semantics = [#tpu.dimension_semantics<parallel>], iteration_bounds = array<i64: 2>, scalar_prefetch = 0 : i64, scratch_operands = 0 : i64, tpu.core_type = #tpu.core_type<tc>, window_params = [{transform_indices = @transform_0, window_bounds = array<i64: 128, 128>}, {pipeline_mode = #tpu.pipeline_mode<synchronous>, transform_indices = @transform_1, window_bounds = array<i64: 128, 128>}, {transform_indices = @transform_2, window_bounds = array<i64: 128, 128>}]} {
    %c0 = arith.constant 0 : index
    %c0_0 = arith.constant 0 : index
    %0 = vector.load %arg1[%c0, %c0_0] : memref<128x128xbf16, #tpu.memory_space<vmem>>, vector<128x128xbf16>
    %c0_1 = arith.constant 0 : index
    %c0_2 = arith.constant 0 : index
    %1 = vector.load %arg2[%c0_1, %c0_2] : memref<128x128xbf16, #tpu.memory_space<vmem>>, vector<128x128xbf16>
    %cst = arith.constant dense<0.000000e+00> : vector<128x128xf32>
    %2 = tpu.matmul %0, %1, %cst {dimension_numbers = #tpu.dot_dimension_numbers<[1], [0], [0], [1], [0, 0, 1, 1], [], []>} : vector<128x128xbf16>, vector<128x128xbf16>, vector<128x128xf32> -> vector<128x128xf32>
    %3 = arith.truncf %2 : vector<128x128xf32> to vector<128x128xbf16>
    %c0_3 = arith.constant 0 : index
    %c0_4 = arith.constant 0 : index
    %4 = vector.load %arg3[%c0_3, %c0_4] : memref<128x128xbf16, #tpu.memory_space<vmem>>, vector<128x128xbf16>
    tpu.vector_store %arg3[%c0_3, %c0_4], %3 {strides = array<i32>} : memref<128x128xbf16, #tpu.memory_space<vmem>>, vector<128x128xbf16>,
    return
  }
  func.func @transform_0(%arg0: i32) -> (i32, i32) {
    %c0_i32 = arith.constant 0 : i32
    %c0_i32_0 = arith.constant 0 : i32
    return %arg0, %c0_i32 : i32, i32
  }
  func.func @transform_1(%arg0: i32) -> (i32, i32) {
    %c0_i32 = arith.constant 0 : i32
    %c0_i32_0 = arith.constant 0 : i32
    %c0_i32_1 = arith.constant 0 : i32
    return %c0_i32, %c0_i32_0 : i32, i32
  }
  func.func @transform_2(%arg0: i32) -> (i32, i32) {
    %c0_i32 = arith.constant 0 : i32
    %c0_i32_0 = arith.constant 0 : i32
    return %arg0, %c0_i32 : i32, i32
  }
}

module attributes {stable_mosaic.version = 11 : i64} {
  func.func @_gcn_agg_kernel(%arg0: i32, %arg1: i32, %arg2: memref<128x256xbf16, #tpu.memory_space<vmem>>, %arg3: memref<256x128xbf16, #tpu.memory_space<vmem>>, %arg4: memref<1x128xf32, #tpu.memory_space<vmem>>, %arg5: memref<128x128xbf16, #tpu.memory_space<vmem>>, %arg6: memref<128x128xf32, #tpu.memory_space<vmem>>) attributes {dimension_semantics = [#tpu.dimension_semantics<parallel>, #tpu.dimension_semantics<arbitrary>], iteration_bounds = array<i64: 2, 1>, scalar_prefetch = 0 : i64, scratch_operands = 1 : i64, tpu.core_type = #tpu.core_type<tc>, window_params = [{transform_indices = @transform_0, window_bounds = array<i64: 128, 256>}, {pipeline_mode = #tpu.pipeline_mode<synchronous>, transform_indices = @transform_1, window_bounds = array<i64: 256, 128>}, {pipeline_mode = #tpu.pipeline_mode<synchronous>, transform_indices = @transform_2, window_bounds = array<i64: 1, 128>}, {transform_indices = @transform_3, window_bounds = array<i64: 128, 128>}]} {
    %c0_i32 = arith.constant 0 : i32
    %0 = arith.cmpi eq, %arg1, %c0_i32 : i32
    %1 = arith.extui %0 : i1 to i32
    %c0_i32_0 = arith.constant 0 : i32
    %2 = arith.cmpi ne, %1, %c0_i32_0 : i32
    scf.if %2 {
      %cst_9 = arith.constant 0.000000e+00 : f32
      %15 = vector.broadcast %cst_9 : f32 to vector<128x128xf32>
      %c0_10 = arith.constant 0 : index
      %c0_11 = arith.constant 0 : index
      %16 = vector.load %arg6[%c0_10, %c0_11] : memref<128x128xf32, #tpu.memory_space<vmem>>, vector<128x128xf32>
      tpu.vector_store %arg6[%c0_10, %c0_11], %15 {strides = array<i32>} : memref<128x128xf32, #tpu.memory_space<vmem>>, vector<128x128xf32>,
    } else {
    }
    %c256_i32 = arith.constant 256 : i32
    %3 = arith.muli %arg1, %c256_i32 : i32
    %4 = tpu.assume_multiple %3, 256 : i32
    %5 = arith.index_cast %4 : i32 to index
    %c0 = arith.constant 0 : index
    %6 = vector.load %arg3[%5, %c0] : memref<256x128xbf16, #tpu.memory_space<vmem>>, vector<256x128xbf16>
    %c0_1 = arith.constant 0 : index
    %c0_2 = arith.constant 0 : index
    %7 = vector.load %arg6[%c0_1, %c0_2] : memref<128x128xf32, #tpu.memory_space<vmem>>, vector<128x128xf32>
    %c0_3 = arith.constant 0 : index
    %c0_4 = arith.constant 0 : index
    %8 = vector.load %arg2[%c0_3, %c0_4] : memref<128x256xbf16, #tpu.memory_space<vmem>>, vector<128x256xbf16>
    %cst = arith.constant dense<0.000000e+00> : vector<128x128xf32>
    %9 = tpu.matmul %8, %6, %cst {dimension_numbers = #tpu.dot_dimension_numbers<[1], [0], [0], [1], [0, 0, 1, 1], [], []>} : vector<128x256xbf16>, vector<256x128xbf16>, vector<128x128xf32> -> vector<128x128xf32>
    %10 = arith.addf %7, %9 : vector<128x128xf32>
    %c0_5 = arith.constant 0 : index
    %c0_6 = arith.constant 0 : index
    %11 = vector.load %arg6[%c0_5, %c0_6] : memref<128x128xf32, #tpu.memory_space<vmem>>, vector<128x128xf32>
    tpu.vector_store %arg6[%c0_5, %c0_6], %10 {strides = array<i32>} : memref<128x128xf32, #tpu.memory_space<vmem>>, vector<128x128xf32>,
    %c0_i32_7 = arith.constant 0 : i32
    %12 = arith.cmpi eq, %arg1, %c0_i32_7 : i32
    %13 = arith.extui %12 : i1 to i32
    %c0_i32_8 = arith.constant 0 : i32
    %14 = arith.cmpi ne, %13, %c0_i32_8 : i32
    scf.if %14 {
      %c0_9 = arith.constant 0 : index
      %c0_10 = arith.constant 0 : index
      %15 = vector.load %arg6[%c0_9, %c0_10] : memref<128x128xf32, #tpu.memory_space<vmem>>, vector<128x128xf32>
      %c0_11 = arith.constant 0 : index
      %c0_12 = arith.constant 0 : index
      %16 = vector.load %arg4[%c0_11, %c0_12] : memref<1x128xf32, #tpu.memory_space<vmem>>, vector<1x128xf32>
      %17 = vector.broadcast %16 : vector<1x128xf32> to vector<128x128xf32>
      %18 = arith.addf %15, %17 : vector<128x128xf32>
      %cst_13 = arith.constant 0.000000e+00 : f32
      %19 = vector.broadcast %cst_13 : f32 to vector<128x128xf32>
      %20 = arith.maximumf %18, %19 : vector<128x128xf32>
      %21 = arith.truncf %20 : vector<128x128xf32> to vector<128x128xbf16>
      %c0_14 = arith.constant 0 : index
      %c0_15 = arith.constant 0 : index
      %22 = vector.load %arg5[%c0_14, %c0_15] : memref<128x128xbf16, #tpu.memory_space<vmem>>, vector<128x128xbf16>
      tpu.vector_store %arg5[%c0_14, %c0_15], %21 {strides = array<i32>} : memref<128x128xbf16, #tpu.memory_space<vmem>>, vector<128x128xbf16>,
    } else {
    }
    return
  }
  func.func @transform_0(%arg0: i32, %arg1: i32) -> (i32, i32) {
    %c0_i32 = arith.constant 0 : i32
    return %arg0, %arg1 : i32, i32
  }
  func.func @transform_1(%arg0: i32, %arg1: i32) -> (i32, i32) {
    %c0_i32 = arith.constant 0 : i32
    %c0_i32_0 = arith.constant 0 : i32
    %c0_i32_1 = arith.constant 0 : i32
    return %c0_i32, %c0_i32_0 : i32, i32
  }
  func.func @transform_2(%arg0: i32, %arg1: i32) -> (i32, i32) {
    %c0_i32 = arith.constant 0 : i32
    %c0_i32_0 = arith.constant 0 : i32
    %c0_i32_1 = arith.constant 0 : i32
    return %c0_i32, %c0_i32_0 : i32, i32
  }
  func.func @transform_3(%arg0: i32, %arg1: i32) -> (i32, i32) {
    %c0_i32 = arith.constant 0 : i32
    %c0_i32_0 = arith.constant 0 : i32
    return %arg0, %c0_i32 : i32, i32
  }
}

module attributes {stable_mosaic.version = 11 : i64} {
  func.func @_gcn_agg_kernel(%arg0: i32, %arg1: i32, %arg2: memref<128x256xbf16, #tpu.memory_space<vmem>>, %arg3: memref<256x128xbf16, #tpu.memory_space<vmem>>, %arg4: memref<1x128xf32, #tpu.memory_space<vmem>>, %arg5: memref<128x128xbf16, #tpu.memory_space<vmem>>, %arg6: memref<128x128xf32, #tpu.memory_space<vmem>>) attributes {dimension_semantics = [#tpu.dimension_semantics<parallel>, #tpu.dimension_semantics<arbitrary>], iteration_bounds = array<i64: 2, 1>, scalar_prefetch = 0 : i64, scratch_operands = 1 : i64, tpu.core_type = #tpu.core_type<tc>, window_params = [{transform_indices = @transform_0, window_bounds = array<i64: 128, 256>}, {pipeline_mode = #tpu.pipeline_mode<synchronous>, transform_indices = @transform_1, window_bounds = array<i64: 256, 128>}, {pipeline_mode = #tpu.pipeline_mode<synchronous>, transform_indices = @transform_2, window_bounds = array<i64: 1, 128>}, {transform_indices = @transform_3, window_bounds = array<i64: 128, 128>}]} {
    %c0_i32 = arith.constant 0 : i32
    %0 = arith.cmpi eq, %arg1, %c0_i32 : i32
    %1 = arith.extui %0 : i1 to i32
    %c0_i32_0 = arith.constant 0 : i32
    %2 = arith.cmpi ne, %1, %c0_i32_0 : i32
    scf.if %2 {
      %cst_9 = arith.constant 0.000000e+00 : f32
      %15 = vector.broadcast %cst_9 : f32 to vector<128x128xf32>
      %c0_10 = arith.constant 0 : index
      %c0_11 = arith.constant 0 : index
      %16 = vector.load %arg6[%c0_10, %c0_11] : memref<128x128xf32, #tpu.memory_space<vmem>>, vector<128x128xf32>
      tpu.vector_store %arg6[%c0_10, %c0_11], %15 {strides = array<i32>} : memref<128x128xf32, #tpu.memory_space<vmem>>, vector<128x128xf32>,
    } else {
    }
    %c256_i32 = arith.constant 256 : i32
    %3 = arith.muli %arg1, %c256_i32 : i32
    %4 = tpu.assume_multiple %3, 256 : i32
    %5 = arith.index_cast %4 : i32 to index
    %c0 = arith.constant 0 : index
    %6 = vector.load %arg3[%5, %c0] : memref<256x128xbf16, #tpu.memory_space<vmem>>, vector<256x128xbf16>
    %c0_1 = arith.constant 0 : index
    %c0_2 = arith.constant 0 : index
    %7 = vector.load %arg6[%c0_1, %c0_2] : memref<128x128xf32, #tpu.memory_space<vmem>>, vector<128x128xf32>
    %c0_3 = arith.constant 0 : index
    %c0_4 = arith.constant 0 : index
    %8 = vector.load %arg2[%c0_3, %c0_4] : memref<128x256xbf16, #tpu.memory_space<vmem>>, vector<128x256xbf16>
    %cst = arith.constant dense<0.000000e+00> : vector<128x128xf32>
    %9 = tpu.matmul %8, %6, %cst {dimension_numbers = #tpu.dot_dimension_numbers<[1], [0], [0], [1], [0, 0, 1, 1], [], []>} : vector<128x256xbf16>, vector<256x128xbf16>, vector<128x128xf32> -> vector<128x128xf32>
    %10 = arith.addf %7, %9 : vector<128x128xf32>
    %c0_5 = arith.constant 0 : index
    %c0_6 = arith.constant 0 : index
    %11 = vector.load %arg6[%c0_5, %c0_6] : memref<128x128xf32, #tpu.memory_space<vmem>>, vector<128x128xf32>
    tpu.vector_store %arg6[%c0_5, %c0_6], %10 {strides = array<i32>} : memref<128x128xf32, #tpu.memory_space<vmem>>, vector<128x128xf32>,
    %c0_i32_7 = arith.constant 0 : i32
    %12 = arith.cmpi eq, %arg1, %c0_i32_7 : i32
    %13 = arith.extui %12 : i1 to i32
    %c0_i32_8 = arith.constant 0 : i32
    %14 = arith.cmpi ne, %13, %c0_i32_8 : i32
    scf.if %14 {
      %c0_9 = arith.constant 0 : index
      %c0_10 = arith.constant 0 : index
      %15 = vector.load %arg6[%c0_9, %c0_10] : memref<128x128xf32, #tpu.memory_space<vmem>>, vector<128x128xf32>
      %c0_11 = arith.constant 0 : index
      %c0_12 = arith.constant 0 : index
      %16 = vector.load %arg4[%c0_11, %c0_12] : memref<1x128xf32, #tpu.memory_space<vmem>>, vector<1x128xf32>
      %17 = vector.broadcast %16 : vector<1x128xf32> to vector<128x128xf32>
      %18 = arith.addf %15, %17 : vector<128x128xf32>
      %19 = arith.truncf %18 : vector<128x128xf32> to vector<128x128xbf16>
      %c0_13 = arith.constant 0 : index
      %c0_14 = arith.constant 0 : index
      %20 = vector.load %arg5[%c0_13, %c0_14] : memref<128x128xbf16, #tpu.memory_space<vmem>>, vector<128x128xbf16>
      tpu.vector_store %arg5[%c0_13, %c0_14], %19 {strides = array<i32>} : memref<128x128xbf16, #tpu.memory_space<vmem>>, vector<128x128xbf16>,
    } else {
    }
    return
  }
  func.func @transform_0(%arg0: i32, %arg1: i32) -> (i32, i32) {
    %c0_i32 = arith.constant 0 : i32
    return %arg0, %arg1 : i32, i32
  }
  func.func @transform_1(%arg0: i32, %arg1: i32) -> (i32, i32) {
    %c0_i32 = arith.constant 0 : i32
    %c0_i32_0 = arith.constant 0 : i32
    %c0_i32_1 = arith.constant 0 : i32
    return %c0_i32, %c0_i32_0 : i32, i32
  }
  func.func @transform_2(%arg0: i32, %arg1: i32) -> (i32, i32) {
    %c0_i32 = arith.constant 0 : i32
    %c0_i32_0 = arith.constant 0 : i32
    %c0_i32_1 = arith.constant 0 : i32
    return %c0_i32, %c0_i32_0 : i32, i32
  }
  func.func @transform_3(%arg0: i32, %arg1: i32) -> (i32, i32) {
    %c0_i32 = arith.constant 0 : i32
    %c0_i32_0 = arith.constant 0 : i32
    return %arg0, %c0_i32 : i32, i32
  }
}

module attributes {stable_mosaic.version = 11 : i64} {
  func.func @_pool_fc_kernel(%arg0: i32, %arg1: memref<16x256xbf16, #tpu.memory_space<vmem>>, %arg2: memref<256x128xbf16, #tpu.memory_space<vmem>>, %arg3: memref<16x1xf32, #tpu.memory_space<vmem>>, %arg4: memref<128x128xf32, #tpu.memory_space<vmem>>, %arg5: memref<1x128xf32, #tpu.memory_space<vmem>>, %arg6: memref<16x128xf32, #tpu.memory_space<vmem>>, %arg7: memref<16x128xf32, #tpu.memory_space<vmem>>) attributes {dimension_semantics = [#tpu.dimension_semantics<arbitrary>], iteration_bounds = array<i64: 1>, scalar_prefetch = 0 : i64, scratch_operands = 1 : i64, tpu.core_type = #tpu.core_type<tc>, window_params = [{transform_indices = @transform_0, window_bounds = array<i64: 16, 256>}, {transform_indices = @transform_1, window_bounds = array<i64: 256, 128>}, {pipeline_mode = #tpu.pipeline_mode<synchronous>, transform_indices = @transform_2, window_bounds = array<i64: 16, 1>}, {pipeline_mode = #tpu.pipeline_mode<synchronous>, transform_indices = @transform_3, window_bounds = array<i64: 128, 128>}, {pipeline_mode = #tpu.pipeline_mode<synchronous>, transform_indices = @transform_4, window_bounds = array<i64: 1, 128>}, {pipeline_mode = #tpu.pipeline_mode<synchronous>, transform_indices = @transform_5, window_bounds = array<i64: 16, 128>}]} {
    %c0_i32 = arith.constant 0 : i32
    %0 = arith.cmpi eq, %arg0, %c0_i32 : i32
    %1 = arith.extui %0 : i1 to i32
    %c0_i32_0 = arith.constant 0 : i32
    %2 = arith.cmpi ne, %1, %c0_i32_0 : i32
    scf.if %2 {
      %cst_10 = arith.constant 0.000000e+00 : f32
      %12 = vector.broadcast %cst_10 : f32 to vector<16x128xf32>
      %c0_11 = arith.constant 0 : index
      %c0_12 = arith.constant 0 : index
      %13 = vector.load %arg7[%c0_11, %c0_12] : memref<16x128xf32, #tpu.memory_space<vmem>>, vector<16x128xf32>
      tpu.vector_store %arg7[%c0_11, %c0_12], %12 {strides = array<i32>} : memref<16x128xf32, #tpu.memory_space<vmem>>, vector<16x128xf32>,
    } else {
    }
    %c0 = arith.constant 0 : index
    %c0_1 = arith.constant 0 : index
    %3 = vector.load %arg7[%c0, %c0_1] : memref<16x128xf32, #tpu.memory_space<vmem>>, vector<16x128xf32>
    %c0_2 = arith.constant 0 : index
    %c0_3 = arith.constant 0 : index
    %4 = vector.load %arg1[%c0_2, %c0_3] : memref<16x256xbf16, #tpu.memory_space<vmem>>, vector<16x256xbf16>
    %c0_4 = arith.constant 0 : index
    %c0_5 = arith.constant 0 : index
    %5 = vector.load %arg2[%c0_4, %c0_5] : memref<256x128xbf16, #tpu.memory_space<vmem>>, vector<256x128xbf16>
    %cst = arith.constant dense<0.000000e+00> : vector<16x128xf32>
    %6 = tpu.matmul %4, %5, %cst {dimension_numbers = #tpu.dot_dimension_numbers<[1], [0], [0], [1], [0, 0, 1, 1], [], []>} : vector<16x256xbf16>, vector<256x128xbf16>, vector<16x128xf32> -> vector<16x128xf32>
    %7 = arith.addf %3, %6 : vector<16x128xf32>
    %c0_6 = arith.constant 0 : index
    %c0_7 = arith.constant 0 : index
    %8 = vector.load %arg7[%c0_6, %c0_7] : memref<16x128xf32, #tpu.memory_space<vmem>>, vector<16x128xf32>
    tpu.vector_store %arg7[%c0_6, %c0_7], %7 {strides = array<i32>} : memref<16x128xf32, #tpu.memory_space<vmem>>, vector<16x128xf32>,
    %c0_i32_8 = arith.constant 0 : i32
    %9 = arith.cmpi eq, %arg0, %c0_i32_8 : i32
    %10 = arith.extui %9 : i1 to i32
    %c0_i32_9 = arith.constant 0 : i32
    %11 = arith.cmpi ne, %10, %c0_i32_9 : i32
    scf.if %11 {
      %c0_10 = arith.constant 0 : index
      %c0_11 = arith.constant 0 : index
      %12 = vector.load %arg7[%c0_10, %c0_11] : memref<16x128xf32, #tpu.memory_space<vmem>>, vector<16x128xf32>
      %c0_12 = arith.constant 0 : index
      %c0_13 = arith.constant 0 : index
      %13 = vector.load %arg3[%c0_12, %c0_13] : memref<16x1xf32, #tpu.memory_space<vmem>>, vector<16x1xf32>
      %14 = vector.broadcast %13 : vector<16x1xf32> to vector<16x128xf32>
      %15 = arith.mulf %12, %14 : vector<16x128xf32>
      %c0_14 = arith.constant 0 : index
      %c0_15 = arith.constant 0 : index
      %16 = vector.load %arg4[%c0_14, %c0_15] : memref<128x128xf32, #tpu.memory_space<vmem>>, vector<128x128xf32>
      %cst_16 = arith.constant dense<0.000000e+00> : vector<16x128xf32>
      %17 = tpu.matmul %15, %16, %cst_16 {dimension_numbers = #tpu.dot_dimension_numbers<[1], [0], [0], [1], [0, 0, 1, 1], [], []>} : vector<16x128xf32>, vector<128x128xf32>, vector<16x128xf32> -> vector<16x128xf32>
      %c0_17 = arith.constant 0 : index
      %c0_18 = arith.constant 0 : index
      %18 = vector.load %arg5[%c0_17, %c0_18] : memref<1x128xf32, #tpu.memory_space<vmem>>, vector<1x128xf32>
      %19 = vector.broadcast %18 : vector<1x128xf32> to vector<16x128xf32>
      %20 = arith.addf %17, %19 : vector<16x128xf32>
      %c0_19 = arith.constant 0 : index
      %c0_20 = arith.constant 0 : index
      %21 = vector.load %arg6[%c0_19, %c0_20] : memref<16x128xf32, #tpu.memory_space<vmem>>, vector<16x128xf32>
      tpu.vector_store %arg6[%c0_19, %c0_20], %20 {strides = array<i32>} : memref<16x128xf32, #tpu.memory_space<vmem>>, vector<16x128xf32>,
    } else {
    }
    return
  }
  func.func @transform_0(%arg0: i32) -> (i32, i32) {
    %c0_i32 = arith.constant 0 : i32
    %c0_i32_0 = arith.constant 0 : i32
    return %c0_i32, %arg0 : i32, i32
  }
  func.func @transform_1(%arg0: i32) -> (i32, i32) {
    %c0_i32 = arith.constant 0 : i32
    %c0_i32_0 = arith.constant 0 : i32
    return %arg0, %c0_i32 : i32, i32
  }
  func.func @transform_2(%arg0: i32) -> (i32, i32) {
    %c0_i32 = arith.constant 0 : i32
    %c0_i32_0 = arith.constant 0 : i32
    %c0_i32_1 = arith.constant 0 : i32
    return %c0_i32, %c0_i32_0 : i32, i32
  }
  func.func @transform_3(%arg0: i32) -> (i32, i32) {
    %c0_i32 = arith.constant 0 : i32
    %c0_i32_0 = arith.constant 0 : i32
    %c0_i32_1 = arith.constant 0 : i32
    return %c0_i32, %c0_i32_0 : i32, i32
  }
  func.func @transform_4(%arg0: i32) -> (i32, i32) {
    %c0_i32 = arith.constant 0 : i32
    %c0_i32_0 = arith.constant 0 : i32
    %c0_i32_1 = arith.constant 0 : i32
    return %c0_i32, %c0_i32_0 : i32, i32
  }
  func.func @transform_5(%arg0: i32) -> (i32, i32) {
    %c0_i32 = arith.constant 0 : i32
    %c0_i32_0 = arith.constant 0 : i32
    %c0_i32_1 = arith.constant 0 : i32
    return %c0_i32, %c0_i32_0 : i32, i32
  }
}

</mosaic_0001>

<bundles_post_ra>
// kernel: net_forward.5
= control target key start
LH: loop header
LB: loop body
LE: loop exit
PB: predicated region body
PF: predicated region fallthrough
CT: control target
= control target key end

     0   :  { %s726_s9 = smov 0   ;;  %s784_s0 = inlined_call_operand.vmem [shape: bf16[256,128], index: 0, kind: input, shape index: {}]   ;;  %s785_s1 = inlined_call_operand.vmem [shape: bf16[128,128], index: 1, kind: input, shape index: {}]   ;;  %s786_s2 = inlined_call_operand.vmem [shape: bf16[256,128], index: 2, kind: output, shape index: {}]  }
   0x1 LB: > { %s509_s10 = sadd.s32 4294967295, %s709_s9   ;;  %p513_p0 = scmp.ge.s32.totalorder %s709_s9, 1  ;;  %s709_s9 = sphi %s726_s9, %s12_s9  }
   0x2   : > { %p113_p1 = scmp.lt.s32.totalorder %s709_s9, 3 }
   0x4   : > { %p114_p2 = pnand %p513_p0, %p113_p1 }
   0x5   : > { %v687_v0 = vld [vmem:[%s785_s1] sm:$0xff] (!%p114_p2)   ;;  %s514_s13 = sshll.u32 (!%p114_p2), %s509_s10, 4  ;;  %v688_v1 = vld [vmem:[%s785_s1 + $0x8] sm:$0xff] (!%p114_p2)   ;;  %v689_v2 = vld [vmem:[%s785_s1 + $0x10] sm:$0xff] (!%p114_p2)  }
   0x6   : > { %117 = sbr.rel (%p114_p2) target bundleno = 264 (0x108), region = 28  ;;  %p136_p3 = scmp.lt.s32.totalorder (!%p114_p2), %s514_s13, 31  ;;  %631 = vmatprep.subr.bf16.mxu0 (!%p114_p2), %v687_v0  ;;  %663 = vmatprep.subr.bf16.mxu1 (!%p114_p2), %v687_v0  ;;  %v690_v3 = vld [vmem:[%s785_s1 + $0x18] sm:$0xff] (!%p114_p2)   ;;  %v691_v6 = vld [vmem:[%s785_s1 + $0x20] sm:$0xff] (!%p114_p2)   ;;  %v692_v7 = vld [vmem:[%s785_s1 + $0x28] sm:$0xff] (!%p114_p2)  }
   0x7   : > { %632 = vmatpush3.bf16.msra.mxu0 (!%p114_p2), %v687_v0  ;;  %671 = vmatpush3.bf16.msra.mxu1 (!%p114_p2), %v687_v0  ;;  %v693_v8 = vld [vmem:[%s785_s1 + $0x30] sm:$0xff] (!%p114_p2)   ;;  %v694_v9 = vld [vmem:[%s785_s1 + $0x38] sm:$0xff] (!%p114_p2)  }
   0x8   : > { %633 = vmatprep.subr.bf16.mxu0 (!%p114_p2), %v688_v1  ;;  %664 = vmatprep.subr.bf16.mxu1 (!%p114_p2), %v688_v1 }
   0xb   : > { %634 = vmatpush3.bf16.msra.mxu0 (!%p114_p2), %v688_v1  ;;  %672 = vmatpush3.bf16.msra.mxu1 (!%p114_p2), %v688_v1 }
   0xc   : > { %635 = vmatprep.subr.bf16.mxu0 (!%p114_p2), %v689_v2  ;;  %665 = vmatprep.subr.bf16.mxu1 (!%p114_p2), %v689_v2 }
   0xd   : > { %s788_s13 = smov (!%p136_p3, %s514_s13), 31 }
   0xe   : > { %s515_s18 = sshll.u32 %s788_s13, 2 }
   0xf   : > { %s751_s21 = scalar_lea.vmem %s784_s0, %s515_s18  ;;  %636 = vmatpush3.bf16.msra.mxu0 %v689_v2  ;;  %673 = vmatpush3.bf16.msra.mxu1 %v689_v2  ;;  %s145_s6 = scalar_lea.vmem %s786_s2, %s515_s18 }
  0x10   : > { %v695_v4 = vld [vmem:[%s751_s21] sm:$0xff]   ;;  %637 = vmatprep.subr.bf16.mxu0 %v690_v3  ;;  %666 = vmatprep.subr.bf16.mxu1 %v690_v3  ;;  %v697_v10 = vld [vmem:[%s751_s21 + $0x8] sm:$0xff]   ;;  %v699_v12 = vld [vmem:[%s751_s21 + $0x10] sm:$0xff]  }
  0x11   : > { %v696_v5 = vld [vmem:[%s751_s21 + $0x20] sm:$0xff]   ;;  %647 = vmatprep.mubr.bf16.mxu0 %v695_v4  ;;  %v698_v11 = vld [vmem:[%s751_s21 + $0x28] sm:$0xff]   ;;  %v700_v13 = vld [vmem:[%s751_s21 + $0x30] sm:$0xff]  }
  0x12   : > { %655 = vmatprep.mubr.bf16.mxu1 %v696_v5  ;;  %v701_v14 = vld [vmem:[%s751_s21 + $0x18] sm:$0xff]  }
  0x13   : > { %638 = vmatpush3.bf16.msra.mxu0 %v690_v3  ;;  %674 = vmatpush3.bf16.msra.mxu1 %v690_v3  ;;  %v702_v15 = vld [vmem:[%s751_s21 + $0x38] sm:$0xff]  }
  0x14   : > { %639 = vmatprep.subr.bf16.mxu0 %v691_v6  ;;  %667 = vmatprep.subr.bf16.mxu1 %v691_v6 }
  0x17   : > { %640 = vmatpush3.bf16.msra.mxu0 %v691_v6  ;;  %675 = vmatpush3.bf16.msra.mxu1 %v691_v6 }
  0x18   : > { %641 = vmatprep.subr.bf16.mxu0 %v692_v7  ;;  %668 = vmatprep.subr.bf16.mxu1 %v692_v7 }
  0x1b   : > { %642 = vmatpush3.bf16.msra.mxu0 %v692_v7  ;;  %676 = vmatpush3.bf16.msra.mxu1 %v692_v7 }
  0x1c   : > { %643 = vmatprep.subr.bf16.mxu0 %v693_v8  ;;  %669 = vmatprep.subr.bf16.mxu1 %v693_v8 }
  0x1f   : > { %644 = vmatpush3.bf16.msra.mxu0 %v693_v8  ;;  %677 = vmatpush3.bf16.msra.mxu1 %v693_v8 }
  0x20   : > { %645 = vmatprep.subr.bf16.mxu0 %v694_v9  ;;  %670 = vmatprep.subr.bf16.mxu1 %v694_v9 }
  0x23   : > { %646 = vmatpush3.bf16.msra.mxu0 %v694_v9  ;;  %678 = vmatpush3.bf16.msra.mxu1 %v694_v9 }
  0x26   : > { %648 = vmatmul.mubr.bf16.vlgmr.msra.gmra.mrb[0].mxu0 %v697_v10  ;;  %656 = vmatmul.mubr.bf16.vlgmr.msra.gmra.mrb[0].mxu1 %v698_v11 }
  0x27   : > { %651 = vmatprep.mubr.bf16.mxu0 %v699_v12  ;;  %659 = vmatprep.mubr.bf16.mxu1 %v700_v13 }
  0x2e   : > { %652 = vmatmul.mubr.bf16.gmra.mrb[4].mxu0 %v701_v14  ;;  %660 = vmatmul.mubr.bf16.gmra.mrb[4].mxu1 %v702_v15 }
  0xf9   : > { %v649_v16 = vpop.f32.mrb[0].mxu0  ;;  %v657_v17 = vpop.f32.mrb[0].mxu1 }
  0xfa   : > { %v310_v18 = vpop.f32.mrb[1].mxu0  ;;  %v342_v19 = vpop.f32.mrb[1].mxu1 }
  0xfb   : > { %v650_v20 = vpop.f32.mrb[2].mxu0  ;;  %v658_v21 = vpop.f32.mrb[2].mxu1 }
  0xfc   : > { %v576_v22 = vpack.c.bf16 %v650_v20, %v649_v16  ;;  %v596_v23 = vpack.c.bf16 %v658_v21, %v657_v17  ;;  %v313_v24 = vpop.f32.mrb[3].mxu0  ;;  %v345_v25 = vpop.f32.mrb[3].mxu1 }
  0xfd   : > { %v571_v26 = vpack.c.bf16 %v313_v24, %v310_v18  ;;  %v591_v27 = vpack.c.bf16 %v345_v25, %v342_v19 }
  0xfe   : > { %608 = vst [vmem:[%s145_s6 + $0x8] sm:$0xff] %v576_v22   ;;  %612 = vst [vmem:[%s145_s6 + $0x28] sm:$0xff] %v596_v23  }
  0xff   : > { %572 = vst [vmem:[%s145_s6] sm:$0xff] %v571_v26   ;;  %611 = vst [vmem:[%s145_s6 + $0x20] sm:$0xff] %v591_v27  }
 0x101   : > { %v653_v28 = vpop.f32.mrb[4].mxu0  ;;  %v661_v29 = vpop.f32.mrb[4].mxu1 }
 0x102   : > { %v326_v30 = vpop.f32.mrb[5].mxu0  ;;  %v358_v31 = vpop.f32.mrb[5].mxu1 }
 0x103   : > { %v654_v32 = vpop.f32.mrb[6].mxu0  ;;  %v662_v33 = vpop.f32.mrb[6].mxu1 }
 0x104   : > { %v586_v34 = vpack.c.bf16 %v654_v32, %v653_v28  ;;  %v606_v35 = vpack.c.bf16 %v662_v33, %v661_v29  ;;  %v329_v36 = vpop.f32.mrb[7].mxu0  ;;  %v361_v37 = vpop.f32.mrb[7].mxu1 }
 0x105   : > { %v581_v38 = vpack.c.bf16 %v329_v36, %v326_v30  ;;  %v601_v39 = vpack.c.bf16 %v361_v37, %v358_v31 }
 0x106   : > { %610 = vst [vmem:[%s145_s6 + $0x18] sm:$0xff] %v586_v34   ;;  %614 = vst [vmem:[%s145_s6 + $0x38] sm:$0xff] %v606_v35  }
 0x107   : > { %609 = vst [vmem:[%s145_s6 + $0x10] sm:$0xff] %v581_v38   ;;  %613 = vst [vmem:[%s145_s6 + $0x30] sm:$0xff] %v601_v39  }
 0x108 PF: > { %s12_s9 = sadd.s32 1, %s709_s9  }
 0x109   : > { %p9_p4 = scmp.ge.s32.totalorder %s12_s9, 4  }
 0x10b   :  { %11 = sbr.rel (!%p9_p4) target bundleno = 1 (0x1), region = 58 }

// kernel: net_forward.6
= control target key start
LH: loop header
LB: loop body
LE: loop exit
PB: predicated region body
PF: predicated region fallthrough
CT: control target
= control target key end

     0   :  { %s1124_s12 = smov 0   ;;  %s1126_s13 = smov 0   ;;  %s1258_s0 = inlined_call_operand.vmem [shape: bf16[256,256], index: 0, kind: input, shape index: {}]   ;;  %s1259_s1 = inlined_call_operand.vmem [shape: bf16[256,128], index: 1, kind: input, shape index: {}]   ;;  %s1260_s2 = inlined_call_operand.vmem [shape: f32[1,128], index: 2, kind: input, shape index: {}]   ;;  %s1261_s3 = inlined_call_operand.vmem [shape: bf16[256,128], index: 3, kind: output, shape index: {}]  }
   0x1   :  { %s1128_s14 = smov 0  }
   0x2 LB: > { %s25_s15 = sadd.s32 1, %s1098_s13  ;;  %p815_p0 = scmp.ge.s32.totalorder %s1102_s14, 1  ;;  %s1102_s14 = sphi %s1128_s14, %s13_s14   ;;  %s1098_s13 = sphi %s1126_s13, %s1263_s13   ;;  %s1094_s12 = sphi %s1124_s12, %s1262_s12  }
   0x3   : > { %p27_p1 = scmp.ge.s32.totalorder %s25_s15, 2  ;;  %p158_p2 = scmp.lt.s32.totalorder %s1102_s14, 3 }
   0x5   : > { %s1265_s15 = smov (%p27_p1, %s25_s15), 0  ;;  %p159_p3 = pnand %p815_p0, %p158_p2 }
   0x6   : > { %v1040_v0 = vld [vmem:[%s1259_s1 + $0x40] sm:$0xff] (!%p159_p3)   ;;  %s816_s18 = sshll.u32 (!%p159_p3), %s1094_s12, 4  ;;  %v1042_v2 = vld [vmem:[%s1259_s1 + $0x48] sm:$0xff] (!%p159_p3)   ;;  %v1044_v4 = vld [vmem:[%s1259_s1 + $0x50] sm:$0xff] (!%p159_p3)  }
   0x7   : > { %162 = sbr.rel (%p159_p3) target bundleno = 288 (0x120), region = 32  ;;  %v1041_v1 = vld [vmem:[%s1259_s1] sm:$0xff] (!%p159_p3)   ;;  %936 = vmatprep.subr.bf16.mxu0 (!%p159_p3), %v1040_v0  ;;  %1000 = vmatprep.subr.bf16.mxu1 (!%p159_p3), %v1040_v0  ;;  %v1043_v3 = vld [vmem:[%s1259_s1 + $0x8] sm:$0xff] (!%p159_p3)   ;;  %p189_p4 = scmp.lt.s32.totalorder (!%p159_p3), %s816_s18, 31  ;;  %v1045_v5 = vld [vmem:[%s1259_s1 + $0x10] sm:$0xff] (!%p159_p3)  }
   0x8   : > { %937 = vmatpush3.bf16.msra.mxu0 (!%p159_p3), %v1041_v1  ;;  %1008 = vmatpush3.bf16.msra.mxu1 (!%p159_p3), %v1041_v1  ;;  %v1046_v6 = vld [vmem:[%s1259_s1 + $0x58] sm:$0xff] (!%p159_p3)   ;;  %v1048_v8 = vld [vmem:[%s1259_s1 + $0x60] sm:$0xff] (!%p159_p3)   ;;  %v1050_v10 = vld [vmem:[%s1259_s1 + $0x68] sm:$0xff] (!%p159_p3)  }
   0x9   : > { %938 = vmatprep.subr.bf16.mxu0 (!%p159_p3), %v1042_v2  ;;  %1001 = vmatprep.subr.bf16.mxu1 (!%p159_p3), %v1042_v2  ;;  %v1047_v7 = vld [vmem:[%s1259_s1 + $0x18] sm:$0xff] (!%p159_p3)   ;;  %v1049_v9 = vld [vmem:[%s1259_s1 + $0x20] sm:$0xff] (!%p159_p3)   ;;  %v1051_v13 = vld [vmem:[%s1259_s1 + $0x28] sm:$0xff] (!%p159_p3)  }
   0xa   : > { %v1052_v14 = vld [vmem:[%s1259_s1 + $0x70] sm:$0xff] (!%p159_p3)   ;;  %v1054_v16 = vld [vmem:[%s1259_s1 + $0x78] sm:$0xff] (!%p159_p3)   ;;  %v1217_v35 = vld [vmem:[%s1260_s2] ss:$0 sm:$0xff] (!%p159_p3) }
   0xb   : > { %v1053_v15 = vld [vmem:[%s1259_s1 + $0x30] sm:$0xff] (!%p159_p3)   ;;  %v1055_v17 = vld [vmem:[%s1259_s1 + $0x38] sm:$0xff] (!%p159_p3)  }
   0xc   : > { %939 = vmatpush3.bf16.msra.mxu0 (!%p159_p3), %v1043_v3  ;;  %1009 = vmatpush3.bf16.msra.mxu1 (!%p159_p3), %v1043_v3 }
   0xd   : > { %940 = vmatprep.subr.bf16.mxu0 (!%p159_p3), %v1044_v4  ;;  %1002 = vmatprep.subr.bf16.mxu1 (!%p159_p3), %v1044_v4 }
   0xe   : > { %s1267_s18 = smov (!%p189_p4, %s816_s18), 31 }
   0xf   : > { %s872_s6 = sshll.u32 %s1267_s18, 3  ;;  %s820_s5 = sshll.u32 %s1267_s18, 2 }
  0x10   : > { %941 = vmatpush3.bf16.msra.mxu0 %v1045_v5  ;;  %1010 = vmatpush3.bf16.msra.mxu1 %v1045_v5  ;;  %s1175_s11 = scalar_lea.vmem %s1258_s0, %s872_s6  ;;  %s1227_s8 = scalar_lea.vmem %s1261_s3, %s820_s5 }
  0x11   : > { %942 = vmatprep.subr.bf16.mxu0 %v1046_v6  ;;  %1003 = vmatprep.subr.bf16.mxu1 %v1046_v6  ;;  %v1058_v11 = vld [vmem:[%s1175_s11 + $0x4] ss:$8 sps:$4 sm:$0xff]   ;;  %v1056_v18 = vld [vmem:[%s1175_s11] ss:$8 sps:$4 sm:$0xff]   ;;  %v1062_v20 = vld [vmem:[%s1175_s11 + $0x14] ss:$8 sps:$4 sm:$0xff]  }
  0x12   : > { %v1061_v12 = vld [vmem:[%s1175_s11 + $0x44] ss:$8 sps:$4 sm:$0xff]   ;;  %503 = vmatprep.mubr.bf16.mxu0 %v1058_v11  ;;  %v1059_v19 = vld [vmem:[%s1175_s11 + $0x40] ss:$8 sps:$4 sm:$0xff]   ;;  %v1064_v21 = vld [vmem:[%s1175_s11 + $0x54] ss:$8 sps:$4 sm:$0xff]  }
  0x13   : > { %535 = vmatprep.mubr.bf16.mxu1 %v1061_v12  ;;  %v1066_v22 = vld [vmem:[%s1175_s11 + $0x10] ss:$8 sps:$4 sm:$0xff]   ;;  %v1068_v24 = vld [vmem:[%s1175_s11 + $0x24] ss:$8 sps:$4 sm:$0xff]   ;;  %v1072_v26 = vld [vmem:[%s1175_s11 + $0x20] ss:$8 sps:$4 sm:$0xff]  }
  0x14   : > { %943 = vmatpush3.bf16.msra.mxu0 %v1047_v7  ;;  %1011 = vmatpush3.bf16.msra.mxu1 %v1047_v7  ;;  %v1067_v23 = vld [vmem:[%s1175_s11 + $0x50] ss:$8 sps:$4 sm:$0xff]   ;;  %v1070_v25 = vld [vmem:[%s1175_s11 + $0x64] ss:$8 sps:$4 sm:$0xff]   ;;  %v1073_v27 = vld [vmem:[%s1175_s11 + $0x60] ss:$8 sps:$4 sm:$0xff]  }
  0x15   : > { %944 = vmatprep.subr.bf16.mxu0 %v1048_v8  ;;  %1004 = vmatprep.subr.bf16.mxu1 %v1048_v8  ;;  %v1074_v28 = vld [vmem:[%s1175_s11 + $0x34] ss:$8 sps:$4 sm:$0xff]   ;;  %v1078_v30 = vld [vmem:[%s1175_s11 + $0x30] ss:$8 sps:$4 sm:$0xff]  }
  0x16   : > { %v1076_v29 = vld [vmem:[%s1175_s11 + $0x74] ss:$8 sps:$4 sm:$0xff]   ;;  %v1079_v31 = vld [vmem:[%s1175_s11 + $0x70] ss:$8 sps:$4 sm:$0xff]  }
  0x18   : > { %945 = vmatpush3.bf16.msra.mxu0 %v1049_v9  ;;  %1012 = vmatpush3.bf16.msra.mxu1 %v1049_v9 }
  0x19   : > { %946 = vmatprep.subr.bf16.mxu0 %v1050_v10  ;;  %1005 = vmatprep.subr.bf16.mxu1 %v1050_v10 }
  0x1c   : > { %947 = vmatpush3.bf16.msra.mxu0 %v1051_v13  ;;  %1013 = vmatpush3.bf16.msra.mxu1 %v1051_v13 }
  0x1d   : > { %948 = vmatprep.subr.bf16.mxu0 %v1052_v14  ;;  %1006 = vmatprep.subr.bf16.mxu1 %v1052_v14 }
  0x20   : > { %949 = vmatpush3.bf16.msra.mxu0 %v1053_v15  ;;  %1014 = vmatpush3.bf16.msra.mxu1 %v1053_v15 }
  0x21   : > { %950 = vmatprep.subr.bf16.mxu0 %v1054_v16  ;;  %1007 = vmatprep.subr.bf16.mxu1 %v1054_v16 }
  0x24   : > { %951 = vmatpush3.bf16.msra.mxu0 %v1055_v17  ;;  %1015 = vmatpush3.bf16.msra.mxu1 %v1055_v17 }
  0x27   : > { %504 = vmatmul.mubr.bf16.vlgmr.msra.gmra.mrb[0].mxu0 %v1056_v18  ;;  %536 = vmatmul.mubr.bf16.vlgmr.msra.gmra.mrb[0].mxu1 %v1059_v19 }
  0x28   : > { %511 = vmatprep.mubr.bf16.mxu0 %v1062_v20  ;;  %543 = vmatprep.mubr.bf16.mxu1 %v1064_v21 }
  0x2f   : > { %512 = vmatmul.mubr.bf16.gmra.mrb[4].mxu0 %v1066_v22  ;;  %544 = vmatmul.mubr.bf16.gmra.mrb[4].mxu1 %v1067_v23 }
  0x30   : > { %519 = vmatprep.mubr.bf16.mxu0 %v1068_v24  ;;  %551 = vmatprep.mubr.bf16.mxu1 %v1070_v25 }
  0x37   : > { %520 = vmatmul.mubr.bf16.gmra.mrb[8].mxu0 %v1072_v26  ;;  %552 = vmatmul.mubr.bf16.gmra.mrb[8].mxu1 %v1073_v27 }
  0x38   : > { %527 = vmatprep.mubr.bf16.mxu0 %v1074_v28  ;;  %559 = vmatprep.mubr.bf16.mxu1 %v1076_v29 }
  0x3f   : > { %528 = vmatmul.mubr.bf16.gmra.mrb[12].mxu0 %v1078_v30  ;;  %560 = vmatmul.mubr.bf16.gmra.mrb[12].mxu1 %v1079_v31 }
  0xfa   : > { %v952_v32 = vpop.f32.mrb[0].mxu0  ;;  %v976_v33 = vpop.f32.mrb[0].mxu1 }
  0xfb   : > { %v953_v34 = vpop.f32.mrb[1].mxu0  ;;  %v977_v36 = vpop.f32.mrb[1].mxu1 }
  0xfc   : > { %v954_v37 = vadd.f32 %v953_v34, %v952_v32  ;;  %v978_v38 = vadd.f32 %v977_v36, %v976_v33  ;;  %v955_v39 = vpop.f32.mrb[2].mxu0  ;;  %v979_v40 = vpop.f32.mrb[2].mxu1 }
  0xfd   : > { %v956_v41 = vpop.f32.mrb[3].mxu0  ;;  %v980_v42 = vpop.f32.mrb[3].mxu1 }
  0xfe   : > { %v626_v43 = vadd.f32 %v954_v37, %v1217_v35  ;;  %v634_v44 = vadd.f32 %v978_v38, %v1217_v35  ;;  %v957_v45 = vadd.f32 %v956_v41, %v955_v39  ;;  %v981_v46 = vadd.f32 %v980_v42, %v979_v40 }
 0x100   : > { %v627_v47 = vadd.f32 %v957_v45, %v1217_v35  ;;  %v635_v48 = vadd.f32 %v981_v46, %v1217_v35  ;;  %v642_v49 = vmax.f32 %v626_v43, 0.0  ;;  %v650_v50 = vmax.f32 %v634_v44, 0.0 }
 0x102   : > { %v643_v51 = vmax.f32 %v627_v47, 0.0  ;;  %v651_v52 = vmax.f32 %v635_v48, 0.0  ;;  %v958_v53 = vpop.f32.mrb[4].mxu0  ;;  %v982_v54 = vpop.f32.mrb[4].mxu1 }
 0x103   : > { %v959_v55 = vpop.f32.mrb[5].mxu0  ;;  %v983_v56 = vpop.f32.mrb[5].mxu1 }
 0x104   : > { %v892_v57 = vpack.c.bf16 %v643_v51, %v642_v49  ;;  %v912_v58 = vpack.c.bf16 %v651_v52, %v650_v50  ;;  %v960_v59 = vadd.f32 %v959_v55, %v958_v53  ;;  %v984_v60 = vadd.f32 %v983_v56, %v982_v54  ;;  %v961_v61 = vpop.f32.mrb[6].mxu0  ;;  %v985_v62 = vpop.f32.mrb[6].mxu1 }
 0x105   : > { %v962_v63 = vpop.f32.mrb[7].mxu0  ;;  %v986_v0 = vpop.f32.mrb[7].mxu1 }
 0x106   : > { %893 = vst [vmem:[%s1227_s8] sm:$0xff] %v892_v57   ;;  %932 = vst [vmem:[%s1227_s8 + $0x20] sm:$0xff] %v912_v58   ;;  %v628_v1 = vadd.f32 %v960_v59, %v1217_v35  ;;  %v636_v2 = vadd.f32 %v984_v60, %v1217_v35  ;;  %v963_v3 = vadd.f32 %v962_v63, %v961_v61 }
 0x107   : > { %v987_v4 = vadd.f32 %v986_v0, %v985_v62 }
 0x108   : > { %v629_v5 = vadd.f32 %v963_v3, %v1217_v35  ;;  %v644_v7 = vmax.f32 %v628_v1, 0.0  ;;  %v652_v8 = vmax.f32 %v636_v2, 0.0 }
 0x109   : > { %v637_v6 = vadd.f32 %v987_v4, %v1217_v35 }
 0x10a   : > { %v645_v9 = vmax.f32 %v629_v5, 0.0  ;;  %v964_v11 = vpop.f32.mrb[8].mxu0  ;;  %v988_v12 = vpop.f32.mrb[8].mxu1 }
 0x10b   : > { %v653_v10 = vmax.f32 %v637_v6, 0.0  ;;  %v965_v13 = vpop.f32.mrb[9].mxu0  ;;  %v989_v14 = vpop.f32.mrb[9].mxu1 }
 0x10c   : > { %v897_v15 = vpack.c.bf16 %v645_v9, %v644_v7  ;;  %v966_v17 = vadd.f32 %v965_v13, %v964_v11  ;;  %v990_v18 = vadd.f32 %v989_v14, %v988_v12  ;;  %v967_v19 = vpop.f32.mrb[10].mxu0  ;;  %v991_v20 = vpop.f32.mrb[10].mxu1 }
 0x10d   : > { %v917_v16 = vpack.c.bf16 %v653_v10, %v652_v8  ;;  %v968_v21 = vpop.f32.mrb[11].mxu0  ;;  %v992_v22 = vpop.f32.mrb[11].mxu1 }
 0x10e   : > { %929 = vst [vmem:[%s1227_s8 + $0x8] sm:$0xff] %v897_v15   ;;  %v630_v23 = vadd.f32 %v966_v17, %v1217_v35  ;;  %v638_v24 = vadd.f32 %v990_v18, %v1217_v35  ;;  %v969_v25 = vadd.f32 %v968_v21, %v967_v19  ;;  %v993_v26 = vadd.f32 %v992_v22, %v991_v20 }
 0x10f   : > { %933 = vst [vmem:[%s1227_s8 + $0x28] sm:$0xff] %v917_v16  }
 0x110   : > { %v631_v27 = vadd.f32 %v969_v25, %v1217_v35  ;;  %v639_v28 = vadd.f32 %v993_v26, %v1217_v35  ;;  %v646_v29 = vmax.f32 %v630_v23, 0.0  ;;  %v654_v30 = vmax.f32 %v638_v24, 0.0 }
 0x112   : > { %v647_v31 = vmax.f32 %v631_v27, 0.0  ;;  %v655_v32 = vmax.f32 %v639_v28, 0.0  ;;  %v970_v33 = vpop.f32.mrb[12].mxu0  ;;  %v994_v34 = vpop.f32.mrb[12].mxu1 }
 0x113   : > { %v971_v36 = vpop.f32.mrb[13].mxu0  ;;  %v995_v37 = vpop.f32.mrb[13].mxu1 }
 0x114   : > { %v902_v38 = vpack.c.bf16 %v647_v31, %v646_v29  ;;  %v922_v39 = vpack.c.bf16 %v655_v32, %v654_v30  ;;  %v972_v40 = vadd.f32 %v971_v36, %v970_v33  ;;  %v996_v41 = vadd.f32 %v995_v37, %v994_v34  ;;  %v973_v42 = vpop.f32.mrb[14].mxu0  ;;  %v997_v43 = vpop.f32.mrb[14].mxu1 }
 0x115   : > { %v974_v44 = vpop.f32.mrb[15].mxu0  ;;  %v998_v45 = vpop.f32.mrb[15].mxu1 }
 0x116   : > { %930 = vst [vmem:[%s1227_s8 + $0x10] sm:$0xff] %v902_v38   ;;  %934 = vst [vmem:[%s1227_s8 + $0x30] sm:$0xff] %v922_v39   ;;  %v632_v46 = vadd.f32 %v972_v40, %v1217_v35  ;;  %v640_v47 = vadd.f32 %v996_v41, %v1217_v35  ;;  %v975_v48 = vadd.f32 %v974_v44, %v973_v42 }
 0x117   : > { %v999_v49 = vadd.f32 %v998_v45, %v997_v43 }
 0x118   : > { %v633_v50 = vadd.f32 %v975_v48, %v1217_v35  ;;  %v648_v52 = vmax.f32 %v632_v46, 0.0  ;;  %v656_v53 = vmax.f32 %v640_v47, 0.0 }
 0x119   : > { %v641_v51 = vadd.f32 %v999_v49, %v1217_v35 }
 0x11a   : > { %v649_v54 = vmax.f32 %v633_v50, 0.0 }
 0x11b   : > { %v657_v55 = vmax.f32 %v641_v51, 0.0 }
 0x11c   : > { %v907_v56 = vpack.c.bf16 %v649_v54, %v648_v52 }
 0x11d   : > { %v927_v57 = vpack.c.bf16 %v657_v55, %v656_v53 }
 0x11e   : > { %931 = vst [vmem:[%s1227_s8 + $0x18] sm:$0xff] %v907_v56  }
 0x11f   : > { %935 = vst [vmem:[%s1227_s8 + $0x38] sm:$0xff] %v927_v57  }
 0x120 PF: > { %s13_s14 = sadd.s32 1, %s1102_s14   ;;  %s1262_s12 = smov %s1098_s13 }
 0x121   : > { %p10_p5 = scmp.ge.s32.totalorder %s13_s14, 4   ;;  %s1263_s13 = smov %s1265_s15 }
 0x123   :  { %12 = sbr.rel (!%p10_p5) target bundleno = 2 (0x2), region = 71 }

// kernel: net_forward.8
= control target key start
LH: loop header
LB: loop body
LE: loop exit
PB: predicated region body
PF: predicated region fallthrough
CT: control target
= control target key end

     0   :  { %s1108_s12 = smov 0   ;;  %s1110_s13 = smov 0   ;;  %s1242_s0 = inlined_call_operand.vmem [shape: bf16[256,256], index: 0, kind: input, shape index: {}]   ;;  %s1243_s1 = inlined_call_operand.vmem [shape: bf16[256,128], index: 1, kind: input, shape index: {}]   ;;  %s1244_s2 = inlined_call_operand.vmem [shape: f32[1,128], index: 2, kind: input, shape index: {}]   ;;  %s1245_s3 = inlined_call_operand.vmem [shape: bf16[256,128], index: 3, kind: output, shape index: {}]  }
   0x1   :  { %s1112_s14 = smov 0  }
   0x2 LB: > { %s25_s15 = sadd.s32 1, %s1082_s13  ;;  %p799_p0 = scmp.ge.s32.totalorder %s1086_s14, 1  ;;  %s1086_s14 = sphi %s1112_s14, %s13_s14   ;;  %s1082_s13 = sphi %s1110_s13, %s1247_s13   ;;  %s1078_s12 = sphi %s1108_s12, %s1246_s12  }
   0x3   : > { %p27_p1 = scmp.ge.s32.totalorder %s25_s15, 2  ;;  %p158_p2 = scmp.lt.s32.totalorder %s1086_s14, 3 }
   0x5   : > { %s1249_s15 = smov (%p27_p1, %s25_s15), 0  ;;  %p159_p3 = pnand %p799_p0, %p158_p2 }
   0x6   : > { %v1024_v0 = vld [vmem:[%s1243_s1 + $0x40] sm:$0xff] (!%p159_p3)   ;;  %s800_s18 = sshll.u32 (!%p159_p3), %s1078_s12, 4  ;;  %v1026_v2 = vld [vmem:[%s1243_s1 + $0x48] sm:$0xff] (!%p159_p3)   ;;  %v1028_v4 = vld [vmem:[%s1243_s1 + $0x50] sm:$0xff] (!%p159_p3)  }
   0x7   : > { %162 = sbr.rel (%p159_p3) target bundleno = 285 (0x11d), region = 32  ;;  %v1025_v1 = vld [vmem:[%s1243_s1] sm:$0xff] (!%p159_p3)   ;;  %920 = vmatprep.subr.bf16.mxu0 (!%p159_p3), %v1024_v0  ;;  %984 = vmatprep.subr.bf16.mxu1 (!%p159_p3), %v1024_v0  ;;  %v1027_v3 = vld [vmem:[%s1243_s1 + $0x8] sm:$0xff] (!%p159_p3)   ;;  %p189_p4 = scmp.lt.s32.totalorder (!%p159_p3), %s800_s18, 31  ;;  %v1029_v5 = vld [vmem:[%s1243_s1 + $0x10] sm:$0xff] (!%p159_p3)  }
   0x8   : > { %921 = vmatpush3.bf16.msra.mxu0 (!%p159_p3), %v1025_v1  ;;  %992 = vmatpush3.bf16.msra.mxu1 (!%p159_p3), %v1025_v1  ;;  %v1030_v6 = vld [vmem:[%s1243_s1 + $0x58] sm:$0xff] (!%p159_p3)   ;;  %v1032_v8 = vld [vmem:[%s1243_s1 + $0x60] sm:$0xff] (!%p159_p3)   ;;  %v1034_v10 = vld [vmem:[%s1243_s1 + $0x68] sm:$0xff] (!%p159_p3)  }
   0x9   : > { %922 = vmatprep.subr.bf16.mxu0 (!%p159_p3), %v1026_v2  ;;  %985 = vmatprep.subr.bf16.mxu1 (!%p159_p3), %v1026_v2  ;;  %v1031_v7 = vld [vmem:[%s1243_s1 + $0x18] sm:$0xff] (!%p159_p3)   ;;  %v1033_v9 = vld [vmem:[%s1243_s1 + $0x20] sm:$0xff] (!%p159_p3)   ;;  %v1035_v13 = vld [vmem:[%s1243_s1 + $0x28] sm:$0xff] (!%p159_p3)  }
   0xa   : > { %v1036_v14 = vld [vmem:[%s1243_s1 + $0x70] sm:$0xff] (!%p159_p3)   ;;  %v1038_v16 = vld [vmem:[%s1243_s1 + $0x78] sm:$0xff] (!%p159_p3)   ;;  %v1201_v40 = vld [vmem:[%s1244_s2] ss:$0 sm:$0xff] (!%p159_p3) }
   0xb   : > { %v1037_v15 = vld [vmem:[%s1243_s1 + $0x30] sm:$0xff] (!%p159_p3)   ;;  %v1039_v17 = vld [vmem:[%s1243_s1 + $0x38] sm:$0xff] (!%p159_p3)  }
   0xc   : > { %923 = vmatpush3.bf16.msra.mxu0 (!%p159_p3), %v1027_v3  ;;  %993 = vmatpush3.bf16.msra.mxu1 (!%p159_p3), %v1027_v3 }
   0xd   : > { %924 = vmatprep.subr.bf16.mxu0 (!%p159_p3), %v1028_v4  ;;  %986 = vmatprep.subr.bf16.mxu1 (!%p159_p3), %v1028_v4 }
   0xe   : > { %s1251_s18 = smov (!%p189_p4, %s800_s18), 31 }
   0xf   : > { %s856_s6 = sshll.u32 %s1251_s18, 3  ;;  %s804_s5 = sshll.u32 %s1251_s18, 2 }
  0x10   : > { %925 = vmatpush3.bf16.msra.mxu0 %v1029_v5  ;;  %994 = vmatpush3.bf16.msra.mxu1 %v1029_v5  ;;  %s1159_s11 = scalar_lea.vmem %s1242_s0, %s856_s6  ;;  %s1211_s8 = scalar_lea.vmem %s1245_s3, %s804_s5 }
  0x11   : > { %926 = vmatprep.subr.bf16.mxu0 %v1030_v6  ;;  %987 = vmatprep.subr.bf16.mxu1 %v1030_v6  ;;  %v1042_v11 = vld [vmem:[%s1159_s11 + $0x4] ss:$8 sps:$4 sm:$0xff]   ;;  %v1040_v18 = vld [vmem:[%s1159_s11] ss:$8 sps:$4 sm:$0xff]   ;;  %v1046_v20 = vld [vmem:[%s1159_s11 + $0x14] ss:$8 sps:$4 sm:$0xff]  }
  0x12   : > { %v1045_v12 = vld [vmem:[%s1159_s11 + $0x44] ss:$8 sps:$4 sm:$0xff]   ;;  %503 = vmatprep.mubr.bf16.mxu0 %v1042_v11  ;;  %v1043_v19 = vld [vmem:[%s1159_s11 + $0x40] ss:$8 sps:$4 sm:$0xff]   ;;  %v1048_v21 = vld [vmem:[%s1159_s11 + $0x54] ss:$8 sps:$4 sm:$0xff]  }
  0x13   : > { %535 = vmatprep.mubr.bf16.mxu1 %v1045_v12  ;;  %v1050_v22 = vld [vmem:[%s1159_s11 + $0x10] ss:$8 sps:$4 sm:$0xff]   ;;  %v1052_v24 = vld [vmem:[%s1159_s11 + $0x24] ss:$8 sps:$4 sm:$0xff]   ;;  %v1056_v26 = vld [vmem:[%s1159_s11 + $0x20] ss:$8 sps:$4 sm:$0xff]  }
  0x14   : > { %927 = vmatpush3.bf16.msra.mxu0 %v1031_v7  ;;  %995 = vmatpush3.bf16.msra.mxu1 %v1031_v7  ;;  %v1051_v23 = vld [vmem:[%s1159_s11 + $0x50] ss:$8 sps:$4 sm:$0xff]   ;;  %v1054_v25 = vld [vmem:[%s1159_s11 + $0x64] ss:$8 sps:$4 sm:$0xff]   ;;  %v1057_v27 = vld [vmem:[%s1159_s11 + $0x60] ss:$8 sps:$4 sm:$0xff]  }
  0x15   : > { %928 = vmatprep.subr.bf16.mxu0 %v1032_v8  ;;  %988 = vmatprep.subr.bf16.mxu1 %v1032_v8  ;;  %v1058_v28 = vld [vmem:[%s1159_s11 + $0x34] ss:$8 sps:$4 sm:$0xff]   ;;  %v1062_v30 = vld [vmem:[%s1159_s11 + $0x30] ss:$8 sps:$4 sm:$0xff]  }
  0x16   : > { %v1060_v29 = vld [vmem:[%s1159_s11 + $0x74] ss:$8 sps:$4 sm:$0xff]   ;;  %v1063_v31 = vld [vmem:[%s1159_s11 + $0x70] ss:$8 sps:$4 sm:$0xff]  }
  0x18   : > { %929 = vmatpush3.bf16.msra.mxu0 %v1033_v9  ;;  %996 = vmatpush3.bf16.msra.mxu1 %v1033_v9 }
  0x19   : > { %930 = vmatprep.subr.bf16.mxu0 %v1034_v10  ;;  %989 = vmatprep.subr.bf16.mxu1 %v1034_v10 }
  0x1c   : > { %931 = vmatpush3.bf16.msra.mxu0 %v1035_v13  ;;  %997 = vmatpush3.bf16.msra.mxu1 %v1035_v13 }
  0x1d   : > { %932 = vmatprep.subr.bf16.mxu0 %v1036_v14  ;;  %990 = vmatprep.subr.bf16.mxu1 %v1036_v14 }
  0x20   : > { %933 = vmatpush3.bf16.msra.mxu0 %v1037_v15  ;;  %998 = vmatpush3.bf16.msra.mxu1 %v1037_v15 }
  0x21   : > { %934 = vmatprep.subr.bf16.mxu0 %v1038_v16  ;;  %991 = vmatprep.subr.bf16.mxu1 %v1038_v16 }
  0x24   : > { %935 = vmatpush3.bf16.msra.mxu0 %v1039_v17  ;;  %999 = vmatpush3.bf16.msra.mxu1 %v1039_v17 }
  0x27   : > { %504 = vmatmul.mubr.bf16.vlgmr.msra.gmra.mrb[0].mxu0 %v1040_v18  ;;  %536 = vmatmul.mubr.bf16.vlgmr.msra.gmra.mrb[0].mxu1 %v1043_v19 }
  0x28   : > { %511 = vmatprep.mubr.bf16.mxu0 %v1046_v20  ;;  %543 = vmatprep.mubr.bf16.mxu1 %v1048_v21 }
  0x2f   : > { %512 = vmatmul.mubr.bf16.gmra.mrb[4].mxu0 %v1050_v22  ;;  %544 = vmatmul.mubr.bf16.gmra.mrb[4].mxu1 %v1051_v23 }
  0x30   : > { %519 = vmatprep.mubr.bf16.mxu0 %v1052_v24  ;;  %551 = vmatprep.mubr.bf16.mxu1 %v1054_v25 }
  0x37   : > { %520 = vmatmul.mubr.bf16.gmra.mrb[8].mxu0 %v1056_v26  ;;  %552 = vmatmul.mubr.bf16.gmra.mrb[8].mxu1 %v1057_v27 }
  0x38   : > { %527 = vmatprep.mubr.bf16.mxu0 %v1058_v28  ;;  %559 = vmatprep.mubr.bf16.mxu1 %v1060_v29 }
  0x3f   : > { %528 = vmatmul.mubr.bf16.gmra.mrb[12].mxu0 %v1062_v30  ;;  %560 = vmatmul.mubr.bf16.gmra.mrb[12].mxu1 %v1063_v31 }
  0xfa   : > { %v936_v32 = vpop.f32.mrb[0].mxu0  ;;  %v960_v33 = vpop.f32.mrb[0].mxu1 }
  0xfb   : > { %v937_v34 = vpop.f32.mrb[1].mxu0  ;;  %v961_v35 = vpop.f32.mrb[1].mxu1 }
  0xfc   : > { %v938_v36 = vadd.f32 %v937_v34, %v936_v32  ;;  %v962_v37 = vadd.f32 %v961_v35, %v960_v33  ;;  %v939_v38 = vpop.f32.mrb[2].mxu0  ;;  %v963_v39 = vpop.f32.mrb[2].mxu1 }
  0xfd   : > { %v940_v41 = vpop.f32.mrb[3].mxu0  ;;  %v964_v42 = vpop.f32.mrb[3].mxu1 }
  0xfe   : > { %v941_v43 = vadd.f32 %v940_v41, %v939_v38  ;;  %v965_v44 = vadd.f32 %v964_v42, %v963_v39  ;;  %v626_v45 = vadd.f32 %v938_v36, %v1201_v40  ;;  %v634_v46 = vadd.f32 %v962_v37, %v1201_v40 }
 0x100   : > { %v627_v47 = vadd.f32 %v941_v43, %v1201_v40  ;;  %v635_v48 = vadd.f32 %v965_v44, %v1201_v40 }
 0x102   : > { %v876_v49 = vpack.c.bf16 %v627_v47, %v626_v45  ;;  %v896_v50 = vpack.c.bf16 %v635_v48, %v634_v46  ;;  %v942_v51 = vpop.f32.mrb[4].mxu0  ;;  %v966_v52 = vpop.f32.mrb[4].mxu1 }
 0x103   : > { %v943_v53 = vpop.f32.mrb[5].mxu0  ;;  %v967_v54 = vpop.f32.mrb[5].mxu1 }
 0x104   : > { %877 = vst [vmem:[%s1211_s8] sm:$0xff] %v876_v49   ;;  %916 = vst [vmem:[%s1211_s8 + $0x20] sm:$0xff] %v896_v50   ;;  %v944_v55 = vadd.f32 %v943_v53, %v942_v51  ;;  %v968_v56 = vadd.f32 %v967_v54, %v966_v52  ;;  %v945_v57 = vpop.f32.mrb[6].mxu0  ;;  %v969_v58 = vpop.f32.mrb[6].mxu1 }
 0x105   : > { %v946_v59 = vpop.f32.mrb[7].mxu0  ;;  %v970_v60 = vpop.f32.mrb[7].mxu1 }
 0x106   : > { %v947_v61 = vadd.f32 %v946_v59, %v945_v57  ;;  %v971_v62 = vadd.f32 %v970_v60, %v969_v58  ;;  %v628_v63 = vadd.f32 %v944_v55, %v1201_v40  ;;  %v636_v0 = vadd.f32 %v968_v56, %v1201_v40 }
 0x108   : > { %v629_v1 = vadd.f32 %v947_v61, %v1201_v40  ;;  %v637_v2 = vadd.f32 %v971_v62, %v1201_v40 }
 0x10a   : > { %v881_v3 = vpack.c.bf16 %v629_v1, %v628_v63  ;;  %v901_v4 = vpack.c.bf16 %v637_v2, %v636_v0  ;;  %v948_v5 = vpop.f32.mrb[8].mxu0  ;;  %v972_v6 = vpop.f32.mrb[8].mxu1 }
 0x10b   : > { %v949_v7 = vpop.f32.mrb[9].mxu0  ;;  %v973_v8 = vpop.f32.mrb[9].mxu1 }
 0x10c   : > { %913 = vst [vmem:[%s1211_s8 + $0x8] sm:$0xff] %v881_v3   ;;  %917 = vst [vmem:[%s1211_s8 + $0x28] sm:$0xff] %v901_v4   ;;  %v950_v9 = vadd.f32 %v949_v7, %v948_v5  ;;  %v974_v10 = vadd.f32 %v973_v8, %v972_v6  ;;  %v951_v11 = vpop.f32.mrb[10].mxu0  ;;  %v975_v12 = vpop.f32.mrb[10].mxu1 }
 0x10d   : > { %v952_v13 = vpop.f32.mrb[11].mxu0  ;;  %v976_v14 = vpop.f32.mrb[11].mxu1 }
 0x10e   : > { %v953_v15 = vadd.f32 %v952_v13, %v951_v11  ;;  %v977_v16 = vadd.f32 %v976_v14, %v975_v12  ;;  %v630_v17 = vadd.f32 %v950_v9, %v1201_v40  ;;  %v638_v18 = vadd.f32 %v974_v10, %v1201_v40 }
 0x110   : > { %v631_v19 = vadd.f32 %v953_v15, %v1201_v40  ;;  %v639_v20 = vadd.f32 %v977_v16, %v1201_v40 }
 0x112   : > { %v886_v21 = vpack.c.bf16 %v631_v19, %v630_v17  ;;  %v906_v22 = vpack.c.bf16 %v639_v20, %v638_v18  ;;  %v954_v23 = vpop.f32.mrb[12].mxu0  ;;  %v978_v24 = vpop.f32.mrb[12].mxu1 }
 0x113   : > { %v955_v25 = vpop.f32.mrb[13].mxu0  ;;  %v979_v26 = vpop.f32.mrb[13].mxu1 }
 0x114   : > { %914 = vst [vmem:[%s1211_s8 + $0x10] sm:$0xff] %v886_v21   ;;  %918 = vst [vmem:[%s1211_s8 + $0x30] sm:$0xff] %v906_v22   ;;  %v956_v27 = vadd.f32 %v955_v25, %v954_v23  ;;  %v980_v28 = vadd.f32 %v979_v26, %v978_v24  ;;  %v957_v29 = vpop.f32.mrb[14].mxu0  ;;  %v981_v30 = vpop.f32.mrb[14].mxu1 }
 0x115   : > { %v958_v31 = vpop.f32.mrb[15].mxu0  ;;  %v982_v32 = vpop.f32.mrb[15].mxu1 }
 0x116   : > { %v959_v33 = vadd.f32 %v958_v31, %v957_v29  ;;  %v983_v34 = vadd.f32 %v982_v32, %v981_v30  ;;  %v632_v35 = vadd.f32 %v956_v27, %v1201_v40  ;;  %v640_v36 = vadd.f32 %v980_v28, %v1201_v40 }
 0x118   : > { %v633_v37 = vadd.f32 %v959_v33, %v1201_v40  ;;  %v641_v38 = vadd.f32 %v983_v34, %v1201_v40 }
 0x11a   : > { %v891_v39 = vpack.c.bf16 %v633_v37, %v632_v35  ;;  %v911_v41 = vpack.c.bf16 %v641_v38, %v640_v36 }
 0x11c   : > { %915 = vst [vmem:[%s1211_s8 + $0x18] sm:$0xff] %v891_v39   ;;  %919 = vst [vmem:[%s1211_s8 + $0x38] sm:$0xff] %v911_v41  }
 0x11d PF: > { %s13_s14 = sadd.s32 1, %s1086_s14   ;;  %s1246_s12 = smov %s1082_s13 }
 0x11e   : > { %p10_p5 = scmp.ge.s32.totalorder %s13_s14, 4   ;;  %s1247_s13 = smov %s1249_s15 }
 0x120   :  { %12 = sbr.rel (!%p10_p5) target bundleno = 2 (0x2), region = 71 }

// kernel: net_forward.9
= control target key start
LH: loop header
LB: loop body
LE: loop exit
PB: predicated region body
PF: predicated region fallthrough
CT: control target
= control target key end

     0   :  { %v484_v1 = vmov 0   ;;  %s632_s1 = inlined_call_operand.vmem [shape: bf16[256,128], index: 1, kind: input, shape index: {}]   ;;  %s633_s0 = inlined_call_operand.vmem [shape: bf16[16,256], index: 0, kind: input, shape index: {}]   ;;  %s634_s2 = inlined_call_operand.vmem [shape: f32[16,1], index: 2, kind: input, shape index: {}]   ;;  %s635_s3 = inlined_call_operand.vmem [shape: f32[128,128], index: 3, kind: input, shape index: {}]   ;;  %s636_s4 = inlined_call_operand.vmem [shape: f32[1,128], index: 4, kind: input, shape index: {}]   ;;  %s637_s5 = inlined_call_operand.vmem [shape: f32[16,128], index: 5, kind: output, shape index: {}]  }
   0x1   :  { %v465_v0 = vld [vmem:[%s632_s1 + $0x40] sm:$0xff]   ;;  %464 = vset.pattern.permute.xlu0 %v484_v1  ;;  %v467_v3 = vld [vmem:[%s632_s1 + $0x48] sm:$0xff]   ;;  %v469_v5 = vld [vmem:[%s632_s1 + $0x50] sm:$0xff]  }
   0x2   :  { %v466_v2 = vld [vmem:[%s632_s1] sm:$0xff]   ;;  %356 = vmatprep.subr.bf16.mxu0 %v465_v0  ;;  %v468_v4 = vld [vmem:[%s632_s1 + $0x8] sm:$0xff]   ;;  %v470_v6 = vld [vmem:[%s632_s1 + $0x10] sm:$0xff]  }
   0x3   :  { %357 = vmatpush3.bf16.msra.mxu0 %v466_v2  ;;  %v471_v7 = vld [vmem:[%s632_s1 + $0x58] sm:$0xff]   ;;  %v473_v9 = vld [vmem:[%s632_s1 + $0x60] sm:$0xff]   ;;  %v475_v11 = vld [vmem:[%s632_s1 + $0x68] sm:$0xff]  }
   0x4   :  { %358 = vmatprep.subr.bf16.mxu0 %v467_v3  ;;  %v472_v8 = vld [vmem:[%s632_s1 + $0x18] sm:$0xff]   ;;  %v474_v10 = vld [vmem:[%s632_s1 + $0x20] sm:$0xff]   ;;  %v234_v15 = vld [vmem:[%s635_s3 + $0x8] sm:$0xff] }
   0x5   :  { %v483_v12 = vld [vmem:[%s633_s0 + $0x4] ss:$8 sps:$4 sm:$0xff]   ;;  %v235_v16 = vld [vmem:[%s635_s3 + $0x10] sm:$0xff]  ;;  %v236_v20 = vld [vmem:[%s635_s3 + $0x18] sm:$0xff] }
   0x6   :  { %v219_v13 = vld [vmem:[%s634_s2] sm:$0xff]  ;;  %v476_v17 = vld [vmem:[%s632_s1 + $0x28] sm:$0xff]   ;;  %201 = vmatprep.mubr.bf16.mxu0 %v483_v12  ;;  %v477_v21 = vld [vmem:[%s632_s1 + $0x70] sm:$0xff]   ;;  %v435_v22 = vpack.c.bf16 %v236_v20, %v235_v16 }
   0x7   :  { %359 = vmatpush3.bf16.msra.mxu0 %v468_v4  ;;  %223 = vperm.xlu0 %464, %v219_v13   ;;  %v233_v14 = vld [vmem:[%s635_s3] sm:$0xff]  ;;  %v220_v18 = vld [vmem:[%s634_s2 + $0x8] sm:$0xff]  ;;  %v478_v25 = vld [vmem:[%s632_s1 + $0x30] sm:$0xff]  }
   0x8   :  { %360 = vmatprep.subr.bf16.mxu0 %v469_v5  ;;  %v431_v19 = vpack.c.bf16 %v234_v15, %v233_v14  ;;  %v237_v23 = vld [vmem:[%s635_s3 + $0x20] sm:$0xff]  ;;  %v238_v24 = vld [vmem:[%s635_s3 + $0x28] sm:$0xff]  ;;  %v479_v27 = vld [vmem:[%s632_s1 + $0x78] sm:$0xff]  }
   0x9   :  { %v439_v26 = vpack.c.bf16 %v238_v24, %v237_v23  ;;  %v239_v28 = vld [vmem:[%s635_s3 + $0x30] sm:$0xff]  ;;  %v240_v29 = vld [vmem:[%s635_s3 + $0x38] sm:$0xff]  ;;  %v241_v32 = vld [vmem:[%s635_s3 + $0x40] sm:$0xff] }
   0xa   :  { %432 = vmatprep.subr.bf16.mxu1 %v431_v19  ;;  %v480_v30 = vld [vmem:[%s632_s1 + $0x38] sm:$0xff]   ;;  %v443_v31 = vpack.c.bf16 %v240_v29, %v239_v28  ;;  %v242_v33 = vld [vmem:[%s635_s3 + $0x48] sm:$0xff]  ;;  %v243_v36 = vld [vmem:[%s635_s3 + $0x50] sm:$0xff] }
   0xb   :  { %361 = vmatpush3.bf16.msra.mxu0 %v470_v6  ;;  %228 = vperm.xlu0 %464, %v220_v18   ;;  %v481_v34 = vld [vmem:[%s633_s0] ss:$8 sps:$4 sm:$0xff]   ;;  %v447_v35 = vpack.c.bf16 %v242_v33, %v241_v32  ;;  %v244_v37 = vld [vmem:[%s635_s3 + $0x58] sm:$0xff]  ;;  %v247_v42 = vld [vmem:[%s635_s3 + $0x70] sm:$0xff] }
   0xc   :  { %362 = vmatprep.subr.bf16.mxu0 %v471_v7  ;;  %434 = vmatpush3.bf16.msra.mxu1 %v431_v19  ;;  %v451_v38 = vpack.c.bf16 %v244_v37, %v243_v36  ;;  %v245_v39 = vld [vmem:[%s635_s3 + $0x60] sm:$0xff]  ;;  %v246_v40 = vld [vmem:[%s635_s3 + $0x68] sm:$0xff]  ;;  %v248_v43 = vld [vmem:[%s635_s3 + $0x78] sm:$0xff] }
   0xd   :  { %436 = vmatprep.subr.bf16.mxu1 %v435_v22  ;;  %v455_v41 = vpack.c.bf16 %v246_v40, %v245_v39  ;;  %v459_v44 = vpack.c.bf16 %v248_v43, %v247_v42  ;;  %v355_v55 = vld [vmem:[%s636_s4] ss:$0 sm:$0xff] }
   0xf   :  { %363 = vmatpush3.bf16.msra.mxu0 %v472_v8 }
  0x10   :  { %364 = vmatprep.subr.bf16.mxu0 %v473_v9  ;;  %438 = vmatpush3.bf16.msra.mxu1 %v435_v22 }
  0x11   :  { %440 = vmatprep.subr.bf16.mxu1 %v439_v26 }
  0x13   :  { %365 = vmatpush3.bf16.msra.mxu0 %v474_v10 }
  0x14   :  { %366 = vmatprep.subr.bf16.mxu0 %v475_v11  ;;  %442 = vmatpush3.bf16.msra.mxu1 %v439_v26 }
  0x15   :  { %444 = vmatprep.subr.bf16.mxu1 %v443_v31 }
  0x17   :  { %367 = vmatpush3.bf16.msra.mxu0 %v476_v17 }
  0x18   :  { %368 = vmatprep.subr.bf16.mxu0 %v477_v21  ;;  %446 = vmatpush3.bf16.msra.mxu1 %v443_v31 }
  0x19   :  { %448 = vmatprep.subr.bf16.mxu1 %v447_v35 }
  0x1b   :  { %369 = vmatpush3.bf16.msra.mxu0 %v478_v25 }
  0x1c   :  { %370 = vmatprep.subr.bf16.mxu0 %v479_v27  ;;  %450 = vmatpush3.bf16.msra.mxu1 %v447_v35 }
  0x1d   :  { %452 = vmatprep.subr.bf16.mxu1 %v451_v38 }
  0x1f   :  { %371 = vmatpush3.bf16.msra.mxu0 %v480_v30 }
  0x20   :  { %454 = vmatpush3.bf16.msra.mxu1 %v451_v38 }
  0x21   :  { %456 = vmatprep.subr.bf16.mxu1 %v455_v41 }
  0x22   :  { %202 = vmatmul.mubr.bf16.vlgmr.msra.gmra.mrb[0].mxu0 %v481_v34 }
  0x24   :  { %458 = vmatpush3.bf16.msra.mxu1 %v455_v41 }
  0x25   :  { %460 = vmatprep.subr.bf16.mxu1 %v459_v44 }
  0x28   :  { %462 = vmatpush3.bf16.msra.mxu1 %v459_v44 }
  0x86   :  { %v224_v45 = vpop.permute.xlu0 %223 }
  0x8a   :  { %v229_v53 = vpop.permute.xlu0 %228 }
  0xf5   :  { %v372_v46 = vpop.f32.mrb[0].mxu0 }
  0xf6   :  { %v373_v47 = vpop.f32.mrb[1].mxu0 }
  0xf7   :  { %v374_v48 = vadd.f32 %v373_v47, %v372_v46  ;;  %v375_v49 = vpop.f32.mrb[2].mxu0 }
  0xf8   :  { %v376_v50 = vpop.f32.mrb[3].mxu0 }
  0xf9   :  { %v377_v51 = vadd.f32 %v376_v50, %v375_v49  ;;  %v231_v52 = vmul.f32 %v374_v48, %v224_v45 }
  0xfb   :  { %v232_v54 = vmul.f32 %v377_v51, %v229_v53  ;;  %428 = vmatprep.mubr.f32.mxu1 %v231_v52 }
  0xfd   :  { %429 = vmatmul.mubr.f32.vlgmr.msra.gmra.mrb[0].mxu1 %v232_v54 }
 0x1d0   :  { %v430_v56 = vpop.f32.mrb[0].mxu1 }
 0x1d1   :  { %v328_v57 = vadd.f32 %v430_v56, %v355_v55  ;;  %v322_v58 = vpop.f32.mrb[1].mxu1 }
 0x1d2   :  { %v323_v59 = vadd.f32 %v355_v55, %v322_v58 }
 0x1d3   :  { %332 = vst [vmem:[%s637_s5 + $0x8] sm:$0xff] %v328_v57 }
 0x1d4   :  { %331 = vst [vmem:[%s637_s5] sm:$0xff] %v323_v59 }

</bundles_post_ra>
